<compile_context>
chip_gen: v6e
topology: v6e:2x2x1
jax: 0.10.0
libtpu: 0.0.40
codegen_flags: <defaults>
</compile_context>

<pallas_src>
import functools

import jax
import jax.numpy as jnp
from jax.experimental import pallas as pl
from jax.experimental.pallas import tpu as pltpu


# ---------------------------------------------------------------------------
# model hyper-parameters (small, synthetic)
# ---------------------------------------------------------------------------
VOCAB = 64
CONTEXT_LEN = 8        # S
WIDTH = 32             # D (transformer width)
HEADS = 2              # H
HEAD_DIM = WIDTH // HEADS
LAYERS = 2
MLP_DIM = 4 * WIDTH    # F
EMBED_DIM = 16         # E (output projection dim)
BATCH = 2


def _layernorm(x, w, b, eps=1e-5):
    mean = jnp.mean(x, axis=-1, keepdims=True)
    var = jnp.mean((x - mean) ** 2, axis=-1, keepdims=True)
    return (x - mean) * jax.lax.rsqrt(var + eps) * w + b


# ---------------------------------------------------------------------------
# fused TextCLIP kernel: one grid step == one transformer layer
# ---------------------------------------------------------------------------
def textclip_kernel(x_ref, onehot_ref,
                    ln1w_ref, ln1b_ref,
                    wq_ref, wk_ref, wv_ref, bq_ref, bk_ref, bv_ref,
                    wo_ref, bo_ref,
                    ln2w_ref, ln2b_ref,
                    wfc_ref, bfc_ref, wpr_ref, bpr_ref,
                    lnfw_ref, lnfb_ref, proj_ref,
                    o_ref,
                    x_sc, *, num_heads):
    li = pl.program_id(0)
    B, S, D = x_ref.shape
    hd = D // num_heads

    # Residual stream resident in VMEM across all layer grid steps.
    @pl.when(li == 0)
    def _():
        x_sc[...] = x_ref[...].reshape(B * S, D)   # batch folded into MXU M-dim

    # Causal mask; broadcast hoisted OUT of the head loop (once per layer step).
    row = jax.lax.broadcasted_iota(jnp.int32, (S, S), 0)
    col = jax.lax.broadcasted_iota(jnp.int32, (S, S), 1)
    mask3 = jnp.broadcast_to(
        jnp.where(col > row, jnp.float32(-1e9), jnp.float32(0.0)), (B, S, S))

    x = x_sc[...]                                                    # (B*S, D) f32

    # ---- attention branch --------------------------------------------------
    h = _layernorm(x, ln1w_ref[0], ln1b_ref[0])                      # f32
    h_bf = h.astype(jnp.bfloat16)                                    # bf16 MXU operand
    wo = wo_ref[0]                                                   # (D, D) bf16

    attn = jnp.zeros((B * S, D), jnp.float32)
    for hh in range(num_heads):      # static tiny loop; head-major weights -> no lane slicing
        # 1/sqrt(hd) is folded into w_q / b_q at init time.
        q = jnp.dot(h_bf, wq_ref[0, hh], preferred_element_type=jnp.float32) + bq_ref[0, hh]
        k = jnp.dot(h_bf, wk_ref[0, hh], preferred_element_type=jnp.float32) + bk_ref[0, hh]
        v = jnp.dot(h_bf, wv_ref[0, hh], preferred_element_type=jnp.float32) + bv_ref[0, hh]
        qb = q.reshape(B, S, hd).astype(jnp.bfloat16)
        kb = k.reshape(B, S, hd).astype(jnp.bfloat16)
        vb = v.reshape(B, S, hd).astype(jnp.bfloat16)

        # NOTE: at real CLIP scale, pre-transpose K once per layer instead of the
        # implicit per-head transpose inside this contraction.
        s = jnp.einsum('bqd,bkd->bqk', qb, kb,
                       preferred_element_type=jnp.float32) + mask3    # (B, S, S) f32
        s = s - jnp.max(s, axis=-1, keepdims=True)
        p = jnp.exp(s)
        p = p * pl.reciprocal(jnp.sum(p, axis=-1, keepdims=True), approx=True)

        ho = jnp.einsum('bqk,bkd->bqd', p.astype(jnp.bfloat16), vb,
                        preferred_element_type=jnp.float32)           # (B, S, hd)
        # sum over heads of (head_out @ rows of w_o) == concat(heads) @ w_o
        attn = attn + jnp.dot(ho.reshape(B * S, hd).astype(jnp.bfloat16),
                              wo[hh * hd:(hh + 1) * hd, :],
                              preferred_element_type=jnp.float32)
    x = x + attn + bo_ref[0]

    # ---- MLP branch (QuickGELU), f32 elementwise, bf16 MXU operands --------
    h2 = _layernorm(x, ln2w_ref[0], ln2b_ref[0]).astype(jnp.bfloat16)
    m = jnp.dot(h2, wfc_ref[0], preferred_element_type=jnp.float32) + bfc_ref[0]
    m = m * jax.nn.sigmoid(1.702 * m)                                # QuickGELU (f32)
    m = jnp.dot(m.astype(jnp.bfloat16), wpr_ref[0],
                preferred_element_type=jnp.float32) + bpr_ref[0]
    x = x + m

    x_sc[...] = x                                                    # carry to next layer

    # ---- fused tail on the last layer step: EOT gather + ln_final + proj ----
    @pl.when(li == pl.num_programs(0) - 1)
    def _():
        xf = x.reshape(B, S, D)
        x_eot = jnp.sum(onehot_ref[...] * xf, axis=1)                # (B, D)
        hf = _layernorm(x_eot, lnfw_ref[...], lnfb_ref[...])
        o_ref[...] = jnp.dot(hf.astype(jnp.bfloat16), proj_ref[...],
                             preferred_element_type=jnp.float32)     # (B, E)


def text_clip_pallas(x, onehot, stacked, lnf_w, lnf_b, proj, *, num_heads, num_layers):
    B, S, D = x.shape
    E = proj.shape[-1]

    def layer_spec(arr):
        # stream one layer's slice per grid step -> double-buffered weight prefetch
        nd = arr.ndim
        return pl.BlockSpec((1,) + arr.shape[1:], lambda li, nd=nd: (li,) + (0,) * (nd - 1))

    def full_spec(arr):
        # layer-invariant operand: same block every step (fetched once)
        nd = arr.ndim
        return pl.BlockSpec(arr.shape, lambda li, nd=nd: (0,) * nd)

    in_specs = ([full_spec(x), full_spec(onehot)]
                + [layer_spec(a) for a in stacked]
                + [full_spec(lnf_w), full_spec(lnf_b), full_spec(proj)])

    return pl.pallas_call(
        functools.partial(textclip_kernel, num_heads=num_heads),
        out_shape=jax.ShapeDtypeStruct((B, E), jnp.float32),
        grid=(num_layers,),
        in_specs=in_specs,
        out_specs=pl.BlockSpec((B, E), lambda li: (0, 0)),
        scratch_shapes=[pltpu.VMEM((B * S, D), jnp.float32)],        # resident residual stream
        compiler_params=pltpu.CompilerParams(
            dimension_semantics=("arbitrary",),                      # layers are sequential
            vmem_limit_bytes=32 * 1024 * 1024),
    )(x, onehot, *stacked, lnf_w, lnf_b, proj)


# ---------------------------------------------------------------------------
# parameter init (deterministic, synthetic)
# ---------------------------------------------------------------------------
def init_params(key):
    D, F, H, hd = WIDTH, MLP_DIM, HEADS, HEAD_DIM
    ks = jax.random.split(key, 12)

    def nrm(k, shape, scale=0.02):
        return scale * jax.random.normal(k, shape, jnp.float32)

    attn_scale = 1.0 / float(hd) ** 0.5
    params = {
        "token_embedding": nrm(ks[0], (VOCAB, D)),
        "positional_embedding": 0.01 * jax.random.normal(ks[1], (CONTEXT_LEN, D), jnp.float32),
        "ln_final_w": jnp.ones((1, D), jnp.float32),
        "ln_final_b": jnp.zeros((1, D), jnp.float32),
        "text_projection": nrm(ks[2], (D, EMBED_DIM)),
        # per-layer weights stacked along a leading layer axis (streamed by the grid)
        "ln1_w": jnp.ones((LAYERS, 1, D), jnp.float32),
        "ln1_b": jnp.zeros((LAYERS, 1, D), jnp.float32),
        # head-major q/k/v weights; 1/sqrt(hd) folded into w_q / b_q at init time
        "w_q": nrm(ks[3], (LAYERS, H, D, hd)) * attn_scale,
        "w_k": nrm(ks[4], (LAYERS, H, D, hd)),
        "w_v": nrm(ks[5], (LAYERS, H, D, hd)),
        "b_q": nrm(ks[6], (LAYERS, H, 1, hd), 0.01) * attn_scale,
        "b_k": nrm(ks[7], (LAYERS, H, 1, hd), 0.01),
        "b_v": nrm(ks[8], (LAYERS, H, 1, hd), 0.01),
        "w_o": nrm(ks[9], (LAYERS, D, D)),
        "b_o": jnp.zeros((LAYERS, 1, D), jnp.float32),
        "ln2_w": jnp.ones((LAYERS, 1, D), jnp.float32),
        "ln2_b": jnp.zeros((LAYERS, 1, D), jnp.float32),
        "w_fc": nrm(ks[10], (LAYERS, D, F)),
        "b_fc": jnp.zeros((LAYERS, 1, F), jnp.float32),
        "w_pr": nrm(ks[11], (LAYERS, F, D)),
        "b_pr": jnp.zeros((LAYERS, 1, D), jnp.float32),
    }
    return params


# ---------------------------------------------------------------------------
# full TextCLIP forward (kernel path) and a pure-JAX f32 reference
# ---------------------------------------------------------------------------
@jax.jit
def text_clip_forward(params, text):
    # TODO(synk): token-embedding gather / argmax EOT selection stay in plain JAX glue
    x = jnp.take(params["token_embedding"], text, axis=0)               # (B, S, D)
    x = x + params["positional_embedding"][None, :, :]
    # PyTorch permute(1,0,2)/back is layout-only; folded away.
    eot = jnp.argmax(text, axis=-1)                                     # (B,)
    onehot = jax.nn.one_hot(eot, text.shape[1], dtype=jnp.float32)[:, :, None]  # (B, S, 1)

    bf = lambda a: a.astype(jnp.bfloat16)                               # bf16 MXU operands
    stacked = (params["ln1_w"], params["ln1_b"],
               bf(params["w_q"]), bf(params["w_k"]), bf(params["w_v"]),
               params["b_q"], params["b_k"], params["b_v"],
               bf(params["w_o"]), params["b_o"],
               params["ln2_w"], params["ln2_b"],
               bf(params["w_fc"]), params["b_fc"],
               bf(params["w_pr"]), params["b_pr"])
    return text_clip_pallas(x, onehot, stacked,
                            params["ln_final_w"], params["ln_final_b"],
                            bf(params["text_projection"]),
                            num_heads=HEADS, num_layers=LAYERS)          # (B, E)


def text_clip_reference(params, text):
    x = jnp.take(params["token_embedding"], text, axis=0) + params["positional_embedding"][None]
    B, S, D = x.shape
    hd = HEAD_DIM
    mask = jnp.where(jnp.arange(S)[None, :] > jnp.arange(S)[:, None], -1e9, 0.0)
    for li in range(LAYERS):
        h = _layernorm(x, params["ln1_w"][li, 0], params["ln1_b"][li, 0])
        attn = jnp.zeros((B, S, D), jnp.float32)
        for hh in range(HEADS):
            # NOTE: 1/sqrt(hd) is already folded into w_q / b_q.
            q = h @ params["w_q"][li, hh] + params["b_q"][li, hh]
            k = h @ params["w_k"][li, hh] + params["b_k"][li, hh]
            v = h @ params["w_v"][li, hh] + params["b_v"][li, hh]
            s = jnp.einsum('bqd,bkd->bqk', q, k) + mask
            p = jax.nn.softmax(s, axis=-1)
            o = jnp.einsum('bqk,bkd->bqd', p, v)
            attn = attn + o @ params["w_o"][li, hh * hd:(hh + 1) * hd, :]
        x = x + attn + params["b_o"][li, 0]
        h2 = _layernorm(x, params["ln2_w"][li, 0], params["ln2_b"][li, 0])
        m = h2 @ params["w_fc"][li] + params["b_fc"][li, 0]
        m = m * jax.nn.sigmoid(1.702 * m)
        x = x + m @ params["w_pr"][li] + params["b_pr"][li, 0]
    x = _layernorm(x, params["ln_final_w"][0], params["ln_final_b"][0])
    eot = jnp.argmax(text, axis=-1)
    return x[jnp.arange(B), eot] @ params["text_projection"]


if __name__ == "__main__":
    key = jax.random.PRNGKey(0)
    pkey, tkey = jax.random.split(key)
    params = init_params(pkey)

    # synthetic token ids; argmax(text) picks the "EOT" position as in CLIP
    text = jax.random.randint(tkey, (BATCH, CONTEXT_LEN), 0, VOCAB, dtype=jnp.int32)

    out = jax.block_until_ready(text_clip_forward(params, text))
    ref = jax.block_until_ready(text_clip_reference(params, text))
    assert out.shape == (BATCH, EMBED_DIM)
    # tolerance accounts for bf16 MXU operands + approx-reciprocal softmax vs the f32 reference
    assert jnp.allclose(out, ref, atol=5e-3, rtol=2e-2), (
        f"max abs err {float(jnp.max(jnp.abs(out - ref)))}")
    print("KERNEL_OK")
</pallas_src>

<mosaic_0001>
module attributes {stable_mosaic.version = 11 : i64} {
  func.func @textclip_kernel(%arg0: i32, %arg1: memref<2x8x32xf32, #tpu.memory_space<vmem>>, %arg2: memref<2x8x1xf32, #tpu.memory_space<vmem>>, %arg3: memref<1x1x32xf32, #tpu.memory_space<vmem>>, %arg4: memref<1x1x32xf32, #tpu.memory_space<vmem>>, %arg5: memref<1x2x32x16xbf16, #tpu.memory_space<vmem>>, %arg6: memref<1x2x32x16xbf16, #tpu.memory_space<vmem>>, %arg7: memref<1x2x32x16xbf16, #tpu.memory_space<vmem>>, %arg8: memref<1x2x1x16xf32, #tpu.memory_space<vmem>>, %arg9: memref<1x2x1x16xf32, #tpu.memory_space<vmem>>, %arg10: memref<1x2x1x16xf32, #tpu.memory_space<vmem>>, %arg11: memref<1x32x32xbf16, #tpu.memory_space<vmem>>, %arg12: memref<1x1x32xf32, #tpu.memory_space<vmem>>, %arg13: memref<1x1x32xf32, #tpu.memory_space<vmem>>, %arg14: memref<1x1x32xf32, #tpu.memory_space<vmem>>, %arg15: memref<1x32x128xbf16, #tpu.memory_space<vmem>>, %arg16: memref<1x1x128xf32, #tpu.memory_space<vmem>>, %arg17: memref<1x128x32xbf16, #tpu.memory_space<vmem>>, %arg18: memref<1x1x32xf32, #tpu.memory_space<vmem>>, %arg19: memref<1x32xf32, #tpu.memory_space<vmem>>, %arg20: memref<1x32xf32, #tpu.memory_space<vmem>>, %arg21: memref<32x16xbf16, #tpu.memory_space<vmem>>, %arg22: memref<2x16xf32, #tpu.memory_space<vmem>>, %arg23: memref<16x32xf32, #tpu.memory_space<vmem>>) attributes {dimension_semantics = [#tpu.dimension_semantics<arbitrary>], iteration_bounds = array<i64: 2>, scalar_prefetch = 0 : i64, scratch_operands = 1 : i64, tpu.core_type = #tpu.core_type<tc>, window_params = [{pipeline_mode = #tpu.pipeline_mode<synchronous>, transform_indices = @transform_0, window_bounds = array<i64: 2, 8, 32>}, {pipeline_mode = #tpu.pipeline_mode<synchronous>, transform_indices = @transform_1, window_bounds = array<i64: 2, 8, 1>}, {transform_indices = @transform_2, window_bounds = array<i64: 1, 1, 32>}, {transform_indices = @transform_3, window_bounds = array<i64: 1, 1, 32>}, {transform_indices = @transform_4, window_bounds = array<i64: 1, 2, 32, 16>}, {transform_indices = @transform_5, window_bounds = array<i64: 1, 2, 32, 16>}, {transform_indices = @transform_6, window_bounds = array<i64: 1, 2, 32, 16>}, {transform_indices = @transform_7, window_bounds = array<i64: 1, 2, 1, 16>}, {transform_indices = @transform_8, window_bounds = array<i64: 1, 2, 1, 16>}, {transform_indices = @transform_9, window_bounds = array<i64: 1, 2, 1, 16>}, {transform_indices = @transform_10, window_bounds = array<i64: 1, 32, 32>}, {transform_indices = @transform_11, window_bounds = array<i64: 1, 1, 32>}, {transform_indices = @transform_12, window_bounds = array<i64: 1, 1, 32>}, {transform_indices = @transform_13, window_bounds = array<i64: 1, 1, 32>}, {transform_indices = @transform_14, window_bounds = array<i64: 1, 32, 128>}, {transform_indices = @transform_15, window_bounds = array<i64: 1, 1, 128>}, {transform_indices = @transform_16, window_bounds = array<i64: 1, 128, 32>}, {transform_indices = @transform_17, window_bounds = array<i64: 1, 1, 32>}, {pipeline_mode = #tpu.pipeline_mode<synchronous>, transform_indices = @transform_18, window_bounds = array<i64: 1, 32>}, {pipeline_mode = #tpu.pipeline_mode<synchronous>, transform_indices = @transform_19, window_bounds = array<i64: 1, 32>}, {pipeline_mode = #tpu.pipeline_mode<synchronous>, transform_indices = @transform_20, window_bounds = array<i64: 32, 16>}, {pipeline_mode = #tpu.pipeline_mode<synchronous>, transform_indices = @transform_21, window_bounds = array<i64: 2, 16>}]} {
    %c0_i32 = arith.constant 0 : i32
    %0 = arith.cmpi eq, %arg0, %c0_i32 : i32
    %1 = arith.extui %0 : i1 to i32
    %c0_i32_0 = arith.constant 0 : i32
    %2 = arith.cmpi ne, %1, %c0_i32_0 : i32
    scf.if %2 {
      %c0_114 = arith.constant 0 : index
      %c0_115 = arith.constant 0 : index
      %c0_116 = arith.constant 0 : index
      %194 = vector.load %arg1[%c0_114, %c0_115, %c0_116] : memref<2x8x32xf32, #tpu.memory_space<vmem>>, vector<2x8x32xf32>
      %195 = vector.shape_cast %194 : vector<2x8x32xf32> to vector<16x32xf32>
      %c0_117 = arith.constant 0 : index
      %c0_118 = arith.constant 0 : index
      %196 = vector.load %arg23[%c0_117, %c0_118] : memref<16x32xf32, #tpu.memory_space<vmem>>, vector<16x32xf32>
      tpu.vector_store %arg23[%c0_117, %c0_118], %195 {strides = array<i32>} : memref<16x32xf32, #tpu.memory_space<vmem>>, vector<16x32xf32>,
    } else {
    }
    %3 = tpu.iota {dimensions = array<i32: 0>} : vector<8x8xi32>
    %4 = tpu.iota {dimensions = array<i32: 1>} : vector<8x8xi32>
    %5 = arith.cmpi sgt, %4, %3 : vector<8x8xi32>
    %cst = arith.constant -1.000000e+09 : f32
    %cst_1 = arith.constant 0.000000e+00 : f32
    %6 = vector.broadcast %cst : f32 to vector<8x8xf32>
    %7 = vector.broadcast %cst_1 : f32 to vector<8x8xf32>
    %8 = arith.select %5, %6, %7 : vector<8x8xi1>, vector<8x8xf32>
    %9 = vector.shape_cast %8 : vector<8x8xf32> to vector<1x8x8xf32>
    %10 = vector.broadcast %9 : vector<1x8x8xf32> to vector<2x8x8xf32>
    %c0 = arith.constant 0 : index
    %c0_2 = arith.constant 0 : index
    %11 = vector.load %arg23[%c0, %c0_2] : memref<16x32xf32, #tpu.memory_space<vmem>>, vector<16x32xf32>
    %c0_3 = arith.constant 0 : index
    %c0_4 = arith.constant 0 : index
    %c0_5 = arith.constant 0 : index
    %12 = vector.load %arg3[%c0_3, %c0_4, %c0_5] : memref<1x1x32xf32, #tpu.memory_space<vmem>>, vector<1x1x32xf32>
    %13 = vector.shape_cast %12 : vector<1x1x32xf32> to vector<1x32xf32>
    %c0_6 = arith.constant 0 : index
    %c0_7 = arith.constant 0 : index
    %c0_8 = arith.constant 0 : index
    %14 = vector.load %arg4[%c0_6, %c0_7, %c0_8] : memref<1x1x32xf32, #tpu.memory_space<vmem>>, vector<1x1x32xf32>
    %15 = vector.shape_cast %14 : vector<1x1x32xf32> to vector<1x32xf32>
    %cst_9 = arith.constant dense<0.000000e+00> : vector<16xf32>
    %16 = vector.multi_reduction <add>, %11, %cst_9 [1] : vector<16x32xf32> to vector<16xf32>
    %17 = vector.shape_cast %16 : vector<16xf32> to vector<16x1xf32>
    %cst_10 = arith.constant 3.200000e+01 : f32
    %18 = vector.broadcast %cst_10 : f32 to vector<16x1xf32>
    %19 = arith.divf %17, %18 : vector<16x1xf32>
    %20 = vector.broadcast %19 : vector<16x1xf32> to vector<16x32xf32>
    %21 = arith.subf %11, %20 : vector<16x32xf32>
    %22 = arith.mulf %21, %21 : vector<16x32xf32>
    %cst_11 = arith.constant dense<0.000000e+00> : vector<16xf32>
    %23 = vector.multi_reduction <add>, %22, %cst_11 [1] : vector<16x32xf32> to vector<16xf32>
    %24 = vector.shape_cast %23 : vector<16xf32> to vector<16x1xf32>
    %cst_12 = arith.constant 3.200000e+01 : f32
    %25 = vector.broadcast %cst_12 : f32 to vector<16x1xf32>
    %26 = arith.divf %24, %25 : vector<16x1xf32>
    %27 = vector.broadcast %19 : vector<16x1xf32> to vector<16x32xf32>
    %28 = arith.subf %11, %27 : vector<16x32xf32>
    %cst_13 = arith.constant 9.99999974E-6 : f32
    %29 = vector.broadcast %cst_13 : f32 to vector<16x1xf32>
    %30 = arith.addf %26, %29 : vector<16x1xf32>
    %31 = math.rsqrt %30 : vector<16x1xf32>
    %32 = vector.broadcast %31 : vector<16x1xf32> to vector<16x32xf32>
    %33 = arith.mulf %28, %32 : vector<16x32xf32>
    %34 = vector.broadcast %13 : vector<1x32xf32> to vector<16x32xf32>
    %35 = arith.mulf %33, %34 : vector<16x32xf32>
    %36 = vector.broadcast %15 : vector<1x32xf32> to vector<16x32xf32>
    %37 = arith.addf %35, %36 : vector<16x32xf32>
    %38 = arith.truncf %37 : vector<16x32xf32> to vector<16x32xbf16>
    %c0_14 = arith.constant 0 : index
    %c0_15 = arith.constant 0 : index
    %c0_16 = arith.constant 0 : index
    %39 = vector.load %arg11[%c0_14, %c0_15, %c0_16] : memref<1x32x32xbf16, #tpu.memory_space<vmem>>, vector<1x32x32xbf16>
    %40 = vector.shape_cast %39 : vector<1x32x32xbf16> to vector<32x32xbf16>
    %cst_17 = arith.constant 0.000000e+00 : f32
    %41 = vector.broadcast %cst_17 : f32 to vector<16x32xf32>
    %c0_18 = arith.constant 0 : index
    %c0_19 = arith.constant 0 : index
    %c0_20 = arith.constant 0 : index
    %c0_21 = arith.constant 0 : index
    %42 = vector.load %arg5[%c0_18, %c0_19, %c0_20, %c0_21] : memref<1x2x32x16xbf16, #tpu.memory_space<vmem>>, vector<1x1x32x16xbf16>
    %43 = vector.shape_cast %42 : vector<1x1x32x16xbf16> to vector<32x16xbf16>
    %cst_22 = arith.constant dense<0.000000e+00> : vector<16x16xf32>
    %44 = tpu.matmul %38, %43, %cst_22 {dimension_numbers = #tpu.dot_dimension_numbers<[1], [0], [0], [1], [0, 0, 1, 1], [], []>} : vector<16x32xbf16>, vector<32x16xbf16>, vector<16x16xf32> -> vector<16x16xf32>
    %c0_23 = arith.constant 0 : index
    %c0_24 = arith.constant 0 : index
    %c0_25 = arith.constant 0 : index
    %c0_26 = arith.constant 0 : index
    %45 = vector.load %arg8[%c0_23, %c0_24, %c0_25, %c0_26] : memref<1x2x1x16xf32, #tpu.memory_space<vmem>>, vector<1x1x1x16xf32>
    %46 = vector.shape_cast %45 : vector<1x1x1x16xf32> to vector<1x16xf32>
    %47 = vector.broadcast %46 : vector<1x16xf32> to vector<16x16xf32>
    %48 = arith.addf %44, %47 : vector<16x16xf32>
    %c0_27 = arith.constant 0 : index
    %c0_28 = arith.constant 0 : index
    %c0_29 = arith.constant 0 : index
    %c0_30 = arith.constant 0 : index
    %49 = vector.load %arg6[%c0_27, %c0_28, %c0_29, %c0_30] : memref<1x2x32x16xbf16, #tpu.memory_space<vmem>>, vector<1x1x32x16xbf16>
    %50 = vector.shape_cast %49 : vector<1x1x32x16xbf16> to vector<32x16xbf16>
    %cst_31 = arith.constant dense<0.000000e+00> : vector<16x16xf32>
    %51 = tpu.matmul %38, %50, %cst_31 {dimension_numbers = #tpu.dot_dimension_numbers<[1], [0], [0], [1], [0, 0, 1, 1], [], []>} : vector<16x32xbf16>, vector<32x16xbf16>, vector<16x16xf32> -> vector<16x16xf32>
    %c0_32 = arith.constant 0 : index
    %c0_33 = arith.constant 0 : index
    %c0_34 = arith.constant 0 : index
    %c0_35 = arith.constant 0 : index
    %52 = vector.load %arg9[%c0_32, %c0_33, %c0_34, %c0_35] : memref<1x2x1x16xf32, #tpu.memory_space<vmem>>, vector<1x1x1x16xf32>
    %53 = vector.shape_cast %52 : vector<1x1x1x16xf32> to vector<1x16xf32>
    %54 = vector.broadcast %53 : vector<1x16xf32> to vector<16x16xf32>
    %55 = arith.addf %51, %54 : vector<16x16xf32>
    %c0_36 = arith.constant 0 : index
    %c0_37 = arith.constant 0 : index
    %c0_38 = arith.constant 0 : index
    %c0_39 = arith.constant 0 : index
    %56 = vector.load %arg7[%c0_36, %c0_37, %c0_38, %c0_39] : memref<1x2x32x16xbf16, #tpu.memory_space<vmem>>, vector<1x1x32x16xbf16>
    %57 = vector.shape_cast %56 : vector<1x1x32x16xbf16> to vector<32x16xbf16>
    %cst_40 = arith.constant dense<0.000000e+00> : vector<16x16xf32>
    %58 = tpu.matmul %38, %57, %cst_40 {dimension_numbers = #tpu.dot_dimension_numbers<[1], [0], [0], [1], [0, 0, 1, 1], [], []>} : vector<16x32xbf16>, vector<32x16xbf16>, vector<16x16xf32> -> vector<16x16xf32>
    %c0_41 = arith.constant 0 : index
    %c0_42 = arith.constant 0 : index
    %c0_43 = arith.constant 0 : index
    %c0_44 = arith.constant 0 : index
    %59 = vector.load %arg10[%c0_41, %c0_42, %c0_43, %c0_44] : memref<1x2x1x16xf32, #tpu.memory_space<vmem>>, vector<1x1x1x16xf32>
    %60 = vector.shape_cast %59 : vector<1x1x1x16xf32> to vector<1x16xf32>
    %61 = vector.broadcast %60 : vector<1x16xf32> to vector<16x16xf32>
    %62 = arith.addf %58, %61 : vector<16x16xf32>
    %63 = vector.shape_cast %48 : vector<16x16xf32> to vector<2x8x16xf32>
    %64 = arith.truncf %63 : vector<2x8x16xf32> to vector<2x8x16xbf16>
    %65 = vector.shape_cast %55 : vector<16x16xf32> to vector<2x8x16xf32>
    %66 = arith.truncf %65 : vector<2x8x16xf32> to vector<2x8x16xbf16>
    %67 = vector.shape_cast %62 : vector<16x16xf32> to vector<2x8x16xf32>
    %68 = arith.truncf %67 : vector<2x8x16xf32> to vector<2x8x16xbf16>
    "tpu.trace_start"() <{level = 10 : i32, message = "bqd,bkd->bqk"}> : () -> ()
    %cst_45 = arith.constant dense<0.000000e+00> : vector<2x8x8xf32>
    %69 = tpu.matmul %64, %66, %cst_45 {dimension_numbers = #tpu.dot_dimension_numbers<[2], [2], [1], [1], [0, 0, 0, 1, 1, 1], [0], [0]>} : vector<2x8x16xbf16>, vector<2x8x16xbf16>, vector<2x8x8xf32> -> vector<2x8x8xf32>
    "tpu.trace_stop"() : () -> ()
    %70 = arith.addf %69, %10 : vector<2x8x8xf32>
    %cst_46 = arith.constant dense<0xFF800000> : vector<2x8xf32>
    %71 = vector.multi_reduction <maximumf>, %70, %cst_46 [2] : vector<2x8x8xf32> to vector<2x8xf32>
    %72 = vector.shape_cast %71 : vector<2x8xf32> to vector<2x8x1xf32>
    %73 = vector.broadcast %72 : vector<2x8x1xf32> to vector<2x8x8xf32>
    %74 = arith.subf %70, %73 : vector<2x8x8xf32>
    %75 = math.exp %74 : vector<2x8x8xf32>
    %cst_47 = arith.constant dense<0.000000e+00> : vector<2x8xf32>
    %76 = vector.multi_reduction <add>, %75, %cst_47 [2] : vector<2x8x8xf32> to vector<2x8xf32>
    %77 = vector.shape_cast %76 : vector<2x8xf32> to vector<2x8x1xf32>
    %78 = tpu.reciprocal %77 {approx = true} : vector<2x8x1xf32> -> vector<2x8x1xf32>
    %79 = vector.broadcast %78 : vector<2x8x1xf32> to vector<2x8x8xf32>
    %80 = arith.mulf %75, %79 : vector<2x8x8xf32>
    %81 = arith.truncf %80 : vector<2x8x8xf32> to vector<2x8x8xbf16>
    "tpu.trace_start"() <{level = 10 : i32, message = "bqk,bkd->bqd"}> : () -> ()
    %cst_48 = arith.constant dense<0.000000e+00> : vector<2x8x16xf32>
    %82 = tpu.matmul %81, %68, %cst_48 {dimension_numbers = #tpu.dot_dimension_numbers<[2], [1], [1], [2], [0, 0, 0, 1, 1, 2], [0], [0]>} : vector<2x8x8xbf16>, vector<2x8x16xbf16>, vector<2x8x16xf32> -> vector<2x8x16xf32>
    "tpu.trace_stop"() : () -> ()
    %83 = vector.shape_cast %82 : vector<2x8x16xf32> to vector<16x16xf32>
    %84 = arith.truncf %83 : vector<16x16xf32> to vector<16x16xbf16>
    %85 = vector.extract_strided_slice %40 {offsets = [0, 0], sizes = [16, 32], strides = [1, 1]} : vector<32x32xbf16> to vector<16x32xbf16>
    %cst_49 = arith.constant dense<0.000000e+00> : vector<16x32xf32>
    %86 = tpu.matmul %84, %85, %cst_49 {dimension_numbers = #tpu.dot_dimension_numbers<[1], [0], [0], [1], [0, 0, 1, 1], [], []>} : vector<16x16xbf16>, vector<16x32xbf16>, vector<16x32xf32> -> vector<16x32xf32>
    %87 = arith.addf %41, %86 : vector<16x32xf32>
    %c0_50 = arith.constant 0 : index
    %c1 = arith.constant 1 : index
    %c0_51 = arith.constant 0 : index
    %c0_52 = arith.constant 0 : index
    %88 = vector.load %arg5[%c0_50, %c1, %c0_51, %c0_52] : memref<1x2x32x16xbf16, #tpu.memory_space<vmem>>, vector<1x1x32x16xbf16>
    %89 = vector.shape_cast %88 : vector<1x1x32x16xbf16> to vector<32x16xbf16>
    %cst_53 = arith.constant dense<0.000000e+00> : vector<16x16xf32>
    %90 = tpu.matmul %38, %89, %cst_53 {dimension_numbers = #tpu.dot_dimension_numbers<[1], [0], [0], [1], [0, 0, 1, 1], [], []>} : vector<16x32xbf16>, vector<32x16xbf16>, vector<16x16xf32> -> vector<16x16xf32>
    %c0_54 = arith.constant 0 : index
    %c1_55 = arith.constant 1 : index
    %c0_56 = arith.constant 0 : index
    %c0_57 = arith.constant 0 : index
    %91 = vector.load %arg8[%c0_54, %c1_55, %c0_56, %c0_57] : memref<1x2x1x16xf32, #tpu.memory_space<vmem>>, vector<1x1x1x16xf32>
    %92 = vector.shape_cast %91 : vector<1x1x1x16xf32> to vector<1x16xf32>
    %93 = vector.broadcast %92 : vector<1x16xf32> to vector<16x16xf32>
    %94 = arith.addf %90, %93 : vector<16x16xf32>
    %c0_58 = arith.constant 0 : index
    %c1_59 = arith.constant 1 : index
    %c0_60 = arith.constant 0 : index
    %c0_61 = arith.constant 0 : index
    %95 = vector.load %arg6[%c0_58, %c1_59, %c0_60, %c0_61] : memref<1x2x32x16xbf16, #tpu.memory_space<vmem>>, vector<1x1x32x16xbf16>
    %96 = vector.shape_cast %95 : vector<1x1x32x16xbf16> to vector<32x16xbf16>
    %cst_62 = arith.constant dense<0.000000e+00> : vector<16x16xf32>
    %97 = tpu.matmul %38, %96, %cst_62 {dimension_numbers = #tpu.dot_dimension_numbers<[1], [0], [0], [1], [0, 0, 1, 1], [], []>} : vector<16x32xbf16>, vector<32x16xbf16>, vector<16x16xf32> -> vector<16x16xf32>
    %c0_63 = arith.constant 0 : index
    %c1_64 = arith.constant 1 : index
    %c0_65 = arith.constant 0 : index
    %c0_66 = arith.constant 0 : index
    %98 = vector.load %arg9[%c0_63, %c1_64, %c0_65, %c0_66] : memref<1x2x1x16xf32, #tpu.memory_space<vmem>>, vector<1x1x1x16xf32>
    %99 = vector.shape_cast %98 : vector<1x1x1x16xf32> to vector<1x16xf32>
    %100 = vector.broadcast %99 : vector<1x16xf32> to vector<16x16xf32>
    %101 = arith.addf %97, %100 : vector<16x16xf32>
    %c0_67 = arith.constant 0 : index
    %c1_68 = arith.constant 1 : index
    %c0_69 = arith.constant 0 : index
    %c0_70 = arith.constant 0 : index
    %102 = vector.load %arg7[%c0_67, %c1_68, %c0_69, %c0_70] : memref<1x2x32x16xbf16, #tpu.memory_space<vmem>>, vector<1x1x32x16xbf16>
    %103 = vector.shape_cast %102 : vector<1x1x32x16xbf16> to vector<32x16xbf16>
    %cst_71 = arith.constant dense<0.000000e+00> : vector<16x16xf32>
    %104 = tpu.matmul %38, %103, %cst_71 {dimension_numbers = #tpu.dot_dimension_numbers<[1], [0], [0], [1], [0, 0, 1, 1], [], []>} : vector<16x32xbf16>, vector<32x16xbf16>, vector<16x16xf32> -> vector<16x16xf32>
    %c0_72 = arith.constant 0 : index
    %c1_73 = arith.constant 1 : index
    %c0_74 = arith.constant 0 : index
    %c0_75 = arith.constant 0 : index
    %105 = vector.load %arg10[%c0_72, %c1_73, %c0_74, %c0_75] : memref<1x2x1x16xf32, #tpu.memory_space<vmem>>, vector<1x1x1x16xf32>
    %106 = vector.shape_cast %105 : vector<1x1x1x16xf32> to vector<1x16xf32>
    %107 = vector.broadcast %106 : vector<1x16xf32> to vector<16x16xf32>
    %108 = arith.addf %104, %107 : vector<16x16xf32>
    %109 = vector.shape_cast %94 : vector<16x16xf32> to vector<2x8x16xf32>
    %110 = arith.truncf %109 : vector<2x8x16xf32> to vector<2x8x16xbf16>
    %111 = vector.shape_cast %101 : vector<16x16xf32> to vector<2x8x16xf32>
    %112 = arith.truncf %111 : vector<2x8x16xf32> to vector<2x8x16xbf16>
    %113 = vector.shape_cast %108 : vector<16x16xf32> to vector<2x8x16xf32>
    %114 = arith.truncf %113 : vector<2x8x16xf32> to vector<2x8x16xbf16>
    "tpu.trace_start"() <{level = 10 : i32, message = "bqd,bkd->bqk"}> : () -> ()
    %cst_76 = arith.constant dense<0.000000e+00> : vector<2x8x8xf32>
    %115 = tpu.matmul %110, %112, %cst_76 {dimension_numbers = #tpu.dot_dimension_numbers<[2], [2], [1], [1], [0, 0, 0, 1, 1, 1], [0], [0]>} : vector<2x8x16xbf16>, vector<2x8x16xbf16>, vector<2x8x8xf32> -> vector<2x8x8xf32>
    "tpu.trace_stop"() : () -> ()
    %116 = arith.addf %115, %10 : vector<2x8x8xf32>
    %cst_77 = arith.constant dense<0xFF800000> : vector<2x8xf32>
    %117 = vector.multi_reduction <maximumf>, %116, %cst_77 [2] : vector<2x8x8xf32> to vector<2x8xf32>
    %118 = vector.shape_cast %117 : vector<2x8xf32> to vector<2x8x1xf32>
    %119 = vector.broadcast %118 : vector<2x8x1xf32> to vector<2x8x8xf32>
    %120 = arith.subf %116, %119 : vector<2x8x8xf32>
    %121 = math.exp %120 : vector<2x8x8xf32>
    %cst_78 = arith.constant dense<0.000000e+00> : vector<2x8xf32>
    %122 = vector.multi_reduction <add>, %121, %cst_78 [2] : vector<2x8x8xf32> to vector<2x8xf32>
    %123 = vector.shape_cast %122 : vector<2x8xf32> to vector<2x8x1xf32>
    %124 = tpu.reciprocal %123 {approx = true} : vector<2x8x1xf32> -> vector<2x8x1xf32>
    %125 = vector.broadcast %124 : vector<2x8x1xf32> to vector<2x8x8xf32>
    %126 = arith.mulf %121, %125 : vector<2x8x8xf32>
    %127 = arith.truncf %126 : vector<2x8x8xf32> to vector<2x8x8xbf16>
    "tpu.trace_start"() <{level = 10 : i32, message = "bqk,bkd->bqd"}> : () -> ()
    %cst_79 = arith.constant dense<0.000000e+00> : vector<2x8x16xf32>
    %128 = tpu.matmul %127, %114, %cst_79 {dimension_numbers = #tpu.dot_dimension_numbers<[2], [1], [1], [2], [0, 0, 0, 1, 1, 2], [0], [0]>} : vector<2x8x8xbf16>, vector<2x8x16xbf16>, vector<2x8x16xf32> -> vector<2x8x16xf32>
    "tpu.trace_stop"() : () -> ()
    %129 = vector.shape_cast %128 : vector<2x8x16xf32> to vector<16x16xf32>
    %130 = arith.truncf %129 : vector<16x16xf32> to vector<16x16xbf16>
    %131 = vector.extract_strided_slice %40 {offsets = [16, 0], sizes = [16, 32], strides = [1, 1]} : vector<32x32xbf16> to vector<16x32xbf16>
    %cst_80 = arith.constant dense<0.000000e+00> : vector<16x32xf32>
    %132 = tpu.matmul %130, %131, %cst_80 {dimension_numbers = #tpu.dot_dimension_numbers<[1], [0], [0], [1], [0, 0, 1, 1], [], []>} : vector<16x16xbf16>, vector<16x32xbf16>, vector<16x32xf32> -> vector<16x32xf32>
    %133 = arith.addf %87, %132 : vector<16x32xf32>
    %134 = arith.addf %11, %133 : vector<16x32xf32>
    %c0_81 = arith.constant 0 : index
    %c0_82 = arith.constant 0 : index
    %c0_83 = arith.constant 0 : index
    %135 = vector.load %arg12[%c0_81, %c0_82, %c0_83] : memref<1x1x32xf32, #tpu.memory_space<vmem>>, vector<1x1x32xf32>
    %136 = vector.shape_cast %135 : vector<1x1x32xf32> to vector<1x32xf32>
    %137 = vector.broadcast %136 : vector<1x32xf32> to vector<16x32xf32>
    %138 = arith.addf %134, %137 : vector<16x32xf32>
    %c0_84 = arith.constant 0 : index
    %c0_85 = arith.constant 0 : index
    %c0_86 = arith.constant 0 : index
    %139 = vector.load %arg13[%c0_84, %c0_85, %c0_86] : memref<1x1x32xf32, #tpu.memory_space<vmem>>, vector<1x1x32xf32>
    %140 = vector.shape_cast %139 : vector<1x1x32xf32> to vector<1x32xf32>
    %c0_87 = arith.constant 0 : index
    %c0_88 = arith.constant 0 : index
    %c0_89 = arith.constant 0 : index
    %141 = vector.load %arg14[%c0_87, %c0_88, %c0_89] : memref<1x1x32xf32, #tpu.memory_space<vmem>>, vector<1x1x32xf32>
    %142 = vector.shape_cast %141 : vector<1x1x32xf32> to vector<1x32xf32>
    %cst_90 = arith.constant dense<0.000000e+00> : vector<16xf32>
    %143 = vector.multi_reduction <add>, %138, %cst_90 [1] : vector<16x32xf32> to vector<16xf32>
    %144 = vector.shape_cast %143 : vector<16xf32> to vector<16x1xf32>
    %cst_91 = arith.constant 3.200000e+01 : f32
    %145 = vector.broadcast %cst_91 : f32 to vector<16x1xf32>
    %146 = arith.divf %144, %145 : vector<16x1xf32>
    %147 = vector.broadcast %146 : vector<16x1xf32> to vector<16x32xf32>
    %148 = arith.subf %138, %147 : vector<16x32xf32>
    %149 = arith.mulf %148, %148 : vector<16x32xf32>
    %cst_92 = arith.constant dense<0.000000e+00> : vector<16xf32>
    %150 = vector.multi_reduction <add>, %149, %cst_92 [1] : vector<16x32xf32> to vector<16xf32>
    %151 = vector.shape_cast %150 : vector<16xf32> to vector<16x1xf32>
    %cst_93 = arith.constant 3.200000e+01 : f32
    %152 = vector.broadcast %cst_93 : f32 to vector<16x1xf32>
    %153 = arith.divf %151, %152 : vector<16x1xf32>
    %154 = vector.broadcast %146 : vector<16x1xf32> to vector<16x32xf32>
    %155 = arith.subf %138, %154 : vector<16x32xf32>
    %cst_94 = arith.constant 9.99999974E-6 : f32
    %156 = vector.broadcast %cst_94 : f32 to vector<16x1xf32>
    %157 = arith.addf %153, %156 : vector<16x1xf32>
    %158 = math.rsqrt %157 : vector<16x1xf32>
    %159 = vector.broadcast %158 : vector<16x1xf32> to vector<16x32xf32>
    %160 = arith.mulf %155, %159 : vector<16x32xf32>
    %161 = vector.broadcast %140 : vector<1x32xf32> to vector<16x32xf32>
    %162 = arith.mulf %160, %161 : vector<16x32xf32>
    %163 = vector.broadcast %142 : vector<1x32xf32> to vector<16x32xf32>
    %164 = arith.addf %162, %163 : vector<16x32xf32>
    %165 = arith.truncf %164 : vector<16x32xf32> to vector<16x32xbf16>
    %c0_95 = arith.constant 0 : index
    %c0_96 = arith.constant 0 : index
    %c0_97 = arith.constant 0 : index
    %166 = vector.load %arg15[%c0_95, %c0_96, %c0_97] : memref<1x32x128xbf16, #tpu.memory_space<vmem>>, vector<1x32x128xbf16>
    %167 = vector.shape_cast %166 : vector<1x32x128xbf16> to vector<32x128xbf16>
    %cst_98 = arith.constant dense<0.000000e+00> : vector<16x128xf32>
    %168 = tpu.matmul %165, %167, %cst_98 {dimension_numbers = #tpu.dot_dimension_numbers<[1], [0], [0], [1], [0, 0, 1, 1], [], []>} : vector<16x32xbf16>, vector<32x128xbf16>, vector<16x128xf32> -> vector<16x128xf32>
    %c0_99 = arith.constant 0 : index
    %c0_100 = arith.constant 0 : index
    %c0_101 = arith.constant 0 : index
    %169 = vector.load %arg16[%c0_99, %c0_100, %c0_101] : memref<1x1x128xf32, #tpu.memory_space<vmem>>, vector<1x1x128xf32>
    %170 = vector.shape_cast %169 : vector<1x1x128xf32> to vector<1x128xf32>
    %171 = vector.broadcast %170 : vector<1x128xf32> to vector<16x128xf32>
    %172 = arith.addf %168, %171 : vector<16x128xf32>
    %cst_102 = arith.constant 1.702000e+00 : f32
    %173 = vector.broadcast %cst_102 : f32 to vector<16x128xf32>
    %174 = arith.mulf %173, %172 : vector<16x128xf32>
    %175 = arith.negf %174 : vector<16x128xf32>
    %176 = math.exp %175 : vector<16x128xf32>
    %cst_103 = arith.constant 1.000000e+00 : f32
    %177 = vector.broadcast %cst_103 : f32 to vector<16x128xf32>
    %178 = arith.addf %177, %176 : vector<16x128xf32>
    %179 = arith.divf %177, %178 : vector<16x128xf32>
    %180 = arith.mulf %172, %179 : vector<16x128xf32>
    %181 = arith.truncf %180 : vector<16x128xf32> to vector<16x128xbf16>
    %c0_104 = arith.constant 0 : index
    %c0_105 = arith.constant 0 : index
    %c0_106 = arith.constant 0 : index
    %182 = vector.load %arg17[%c0_104, %c0_105, %c0_106] : memref<1x128x32xbf16, #tpu.memory_space<vmem>>, vector<1x128x32xbf16>
    %183 = vector.shape_cast %182 : vector<1x128x32xbf16> to vector<128x32xbf16>
    %cst_107 = arith.constant dense<0.000000e+00> : vector<16x32xf32>
    %184 = tpu.matmul %181, %183, %cst_107 {dimension_numbers = #tpu.dot_dimension_numbers<[1], [0], [0], [1], [0, 0, 1, 1], [], []>} : vector<16x128xbf16>, vector<128x32xbf16>, vector<16x32xf32> -> vector<16x32xf32>
    %c0_108 = arith.constant 0 : index
    %c0_109 = arith.constant 0 : index
    %c0_110 = arith.constant 0 : index
    %185 = vector.load %arg18[%c0_108, %c0_109, %c0_110] : memref<1x1x32xf32, #tpu.memory_space<vmem>>, vector<1x1x32xf32>
    %186 = vector.shape_cast %185 : vector<1x1x32xf32> to vector<1x32xf32>
    %187 = vector.broadcast %186 : vector<1x32xf32> to vector<16x32xf32>
    %188 = arith.addf %184, %187 : vector<16x32xf32>
    %189 = arith.addf %138, %188 : vector<16x32xf32>
    %c0_111 = arith.constant 0 : index
    %c0_112 = arith.constant 0 : index
    %190 = vector.load %arg23[%c0_111, %c0_112] : memref<16x32xf32, #tpu.memory_space<vmem>>, vector<16x32xf32>
    tpu.vector_store %arg23[%c0_111, %c0_112], %189 {strides = array<i32>} : memref<16x32xf32, #tpu.memory_space<vmem>>, vector<16x32xf32>,
    %c1_i32 = arith.constant 1 : i32
    %191 = arith.cmpi eq, %arg0, %c1_i32 : i32
    %192 = arith.extui %191 : i1 to i32
    %c0_i32_113 = arith.constant 0 : i32
    %193 = arith.cmpi ne, %192, %c0_i32_113 : i32
    scf.if %193 {
      %194 = vector.shape_cast %189 : vector<16x32xf32> to vector<2x8x32xf32>
      %c0_114 = arith.constant 0 : index
      %c0_115 = arith.constant 0 : index
      %c0_116 = arith.constant 0 : index
      %195 = vector.load %arg2[%c0_114, %c0_115, %c0_116] : memref<2x8x1xf32, #tpu.memory_space<vmem>>, vector<2x8x1xf32>
      %196 = vector.broadcast %195 : vector<2x8x1xf32> to vector<2x8x32xf32>
      %197 = arith.mulf %196, %194 : vector<2x8x32xf32>
      %cst_117 = arith.constant dense<0.000000e+00> : vector<2x32xf32>
      %198 = vector.multi_reduction <add>, %197, %cst_117 [1] : vector<2x8x32xf32> to vector<2x32xf32>
      %c0_118 = arith.constant 0 : index
      %c0_119 = arith.constant 0 : index
      %199 = vector.load %arg19[%c0_118, %c0_119] : memref<1x32xf32, #tpu.memory_space<vmem>>, vector<1x32xf32>
      %c0_120 = arith.constant 0 : index
      %c0_121 = arith.constant 0 : index
      %200 = vector.load %arg20[%c0_120, %c0_121] : memref<1x32xf32, #tpu.memory_space<vmem>>, vector<1x32xf32>
      %cst_122 = arith.constant dense<0.000000e+00> : vector<2xf32>
      %201 = vector.multi_reduction <add>, %198, %cst_122 [1] : vector<2x32xf32> to vector<2xf32>
      %202 = vector.shape_cast %201 : vector<2xf32> to vector<2x1xf32>
      %cst_123 = arith.constant 3.200000e+01 : f32
      %203 = vector.broadcast %cst_123 : f32 to vector<2x1xf32>
      %204 = arith.divf %202, %203 : vector<2x1xf32>
      %205 = vector.broadcast %204 : vector<2x1xf32> to vector<2x32xf32>
      %206 = arith.subf %198, %205 : vector<2x32xf32>
      %207 = arith.mulf %206, %206 : vector<2x32xf32>
      %cst_124 = arith.constant dense<0.000000e+00> : vector<2xf32>
      %208 = vector.multi_reduction <add>, %207, %cst_124 [1] : vector<2x32xf32> to vector<2xf32>
      %209 = vector.shape_cast %208 : vector<2xf32> to vector<2x1xf32>
      %cst_125 = arith.constant 3.200000e+01 : f32
      %210 = vector.broadcast %cst_125 : f32 to vector<2x1xf32>
      %211 = arith.divf %209, %210 : vector<2x1xf32>
      %212 = vector.broadcast %204 : vector<2x1xf32> to vector<2x32xf32>
      %213 = arith.subf %198, %212 : vector<2x32xf32>
      %cst_126 = arith.constant 9.99999974E-6 : f32
      %214 = vector.broadcast %cst_126 : f32 to vector<2x1xf32>
      %215 = arith.addf %211, %214 : vector<2x1xf32>
      %216 = math.rsqrt %215 : vector<2x1xf32>
      %217 = vector.broadcast %216 : vector<2x1xf32> to vector<2x32xf32>
      %218 = arith.mulf %213, %217 : vector<2x32xf32>
      %219 = vector.broadcast %199 : vector<1x32xf32> to vector<2x32xf32>
      %220 = arith.mulf %218, %219 : vector<2x32xf32>
      %221 = vector.broadcast %200 : vector<1x32xf32> to vector<2x32xf32>
      %222 = arith.addf %220, %221 : vector<2x32xf32>
      %223 = arith.truncf %222 : vector<2x32xf32> to vector<2x32xbf16>
      %c0_127 = arith.constant 0 : index
      %c0_128 = arith.constant 0 : index
      %224 = vector.load %arg21[%c0_127, %c0_128] : memref<32x16xbf16, #tpu.memory_space<vmem>>, vector<32x16xbf16>
      %cst_129 = arith.constant dense<0.000000e+00> : vector<2x16xf32>
      %225 = tpu.matmul %223, %224, %cst_129 {dimension_numbers = #tpu.dot_dimension_numbers<[1], [0], [0], [1], [0, 0, 1, 1], [], []>} : vector<2x32xbf16>, vector<32x16xbf16>, vector<2x16xf32> -> vector<2x16xf32>
      %c0_130 = arith.constant 0 : index
      %c0_131 = arith.constant 0 : index
      %226 = vector.load %arg22[%c0_130, %c0_131] : memref<2x16xf32, #tpu.memory_space<vmem>>, vector<2x16xf32>
      tpu.vector_store %arg22[%c0_130, %c0_131], %225 {strides = array<i32>} : memref<2x16xf32, #tpu.memory_space<vmem>>, vector<2x16xf32>,
    } else {
    }
    return
  }
  func.func @transform_0(%arg0: i32) -> (i32, i32, i32) {
    %c0_i32 = arith.constant 0 : i32
    %c0_i32_0 = arith.constant 0 : i32
    %c0_i32_1 = arith.constant 0 : i32
    %c0_i32_2 = arith.constant 0 : i32
    return %c0_i32, %c0_i32_0, %c0_i32_1 : i32, i32, i32
  }
  func.func @transform_1(%arg0: i32) -> (i32, i32, i32) {
    %c0_i32 = arith.constant 0 : i32
    %c0_i32_0 = arith.constant 0 : i32
    %c0_i32_1 = arith.constant 0 : i32
    %c0_i32_2 = arith.constant 0 : i32
    return %c0_i32, %c0_i32_0, %c0_i32_1 : i32, i32, i32
  }
  func.func @transform_2(%arg0: i32) -> (i32, i32, i32) {
    %c0_i32 = arith.constant 0 : i32
    %c0_i32_0 = arith.constant 0 : i32
    %c0_i32_1 = arith.constant 0 : i32
    return %arg0, %c0_i32, %c0_i32_0 : i32, i32, i32
  }
  func.func @transform_3(%arg0: i32) -> (i32, i32, i32) {
    %c0_i32 = arith.constant 0 : i32
    %c0_i32_0 = arith.constant 0 : i32
    %c0_i32_1 = arith.constant 0 : i32
    return %arg0, %c0_i32, %c0_i32_0 : i32, i32, i32
  }
  func.func @transform_4(%arg0: i32) -> (i32, i32, i32, i32) {
    %c0_i32 = arith.constant 0 : i32
    %c0_i32_0 = arith.constant 0 : i32
    %c0_i32_1 = arith.constant 0 : i32
    %c0_i32_2 = arith.constant 0 : i32
    return %arg0, %c0_i32, %c0_i32_0, %c0_i32_1 : i32, i32, i32, i32
  }
  func.func @transform_5(%arg0: i32) -> (i32, i32, i32, i32) {
    %c0_i32 = arith.constant 0 : i32
    %c0_i32_0 = arith.constant 0 : i32
    %c0_i32_1 = arith.constant 0 : i32
    %c0_i32_2 = arith.constant 0 : i32
    return %arg0, %c0_i32, %c0_i32_0, %c0_i32_1 : i32, i32, i32, i32
  }
  func.func @transform_6(%arg0: i32) -> (i32, i32, i32, i32) {
    %c0_i32 = arith.constant 0 : i32
    %c0_i32_0 = arith.constant 0 : i32
    %c0_i32_1 = arith.constant 0 : i32
    %c0_i32_2 = arith.constant 0 : i32
    return %arg0, %c0_i32, %c0_i32_0, %c0_i32_1 : i32, i32, i32, i32
  }
  func.func @transform_7(%arg0: i32) -> (i32, i32, i32, i32) {
    %c0_i32 = arith.constant 0 : i32
    %c0_i32_0 = arith.constant 0 : i32
    %c0_i32_1 = arith.constant 0 : i32
    %c0_i32_2 = arith.constant 0 : i32
    return %arg0, %c0_i32, %c0_i32_0, %c0_i32_1 : i32, i32, i32, i32
  }
  func.func @transform_8(%arg0: i32) -> (i32, i32, i32, i32) {
    %c0_i32 = arith.constant 0 : i32
    %c0_i32_0 = arith.constant 0 : i32
    %c0_i32_1 = arith.constant 0 : i32
    %c0_i32_2 = arith.constant 0 : i32
    return %arg0, %c0_i32, %c0_i32_0, %c0_i32_1 : i32, i32, i32, i32
  }
  func.func @transform_9(%arg0: i32) -> (i32, i32, i32, i32) {
    %c0_i32 = arith.constant 0 : i32
    %c0_i32_0 = arith.constant 0 : i32
    %c0_i32_1 = arith.constant 0 : i32
    %c0_i32_2 = arith.constant 0 : i32
    return %arg0, %c0_i32, %c0_i32_0, %c0_i32_1 : i32, i32, i32, i32
  }
  func.func @transform_10(%arg0: i32) -> (i32, i32, i32) {
    %c0_i32 = arith.constant 0 : i32
    %c0_i32_0 = arith.constant 0 : i32
    %c0_i32_1 = arith.constant 0 : i32
    return %arg0, %c0_i32, %c0_i32_0 : i32, i32, i32
  }
  func.func @transform_11(%arg0: i32) -> (i32, i32, i32) {
    %c0_i32 = arith.constant 0 : i32
    %c0_i32_0 = arith.constant 0 : i32
    %c0_i32_1 = arith.constant 0 : i32
    return %arg0, %c0_i32, %c0_i32_0 : i32, i32, i32
  }
  func.func @transform_12(%arg0: i32) -> (i32, i32, i32) {
    %c0_i32 = arith.constant 0 : i32
    %c0_i32_0 = arith.constant 0 : i32
    %c0_i32_1 = arith.constant 0 : i32
    return %arg0, %c0_i32, %c0_i32_0 : i32, i32, i32
  }
  func.func @transform_13(%arg0: i32) -> (i32, i32, i32) {
    %c0_i32 = arith.constant 0 : i32
    %c0_i32_0 = arith.constant 0 : i32
    %c0_i32_1 = arith.constant 0 : i32
    return %arg0, %c0_i32, %c0_i32_0 : i32, i32, i32
  }
  func.func @transform_14(%arg0: i32) -> (i32, i32, i32) {
    %c0_i32 = arith.constant 0 : i32
    %c0_i32_0 = arith.constant 0 : i32
    %c0_i32_1 = arith.constant 0 : i32
    return %arg0, %c0_i32, %c0_i32_0 : i32, i32, i32
  }
  func.func @transform_15(%arg0: i32) -> (i32, i32, i32) {
    %c0_i32 = arith.constant 0 : i32
    %c0_i32_0 = arith.constant 0 : i32
    %c0_i32_1 = arith.constant 0 : i32
    return %arg0, %c0_i32, %c0_i32_0 : i32, i32, i32
  }
  func.func @transform_16(%arg0: i32) -> (i32, i32, i32) {
    %c0_i32 = arith.constant 0 : i32
    %c0_i32_0 = arith.constant 0 : i32
    %c0_i32_1 = arith.constant 0 : i32
    return %arg0, %c0_i32, %c0_i32_0 : i32, i32, i32
  }
  func.func @transform_17(%arg0: i32) -> (i32, i32, i32) {
    %c0_i32 = arith.constant 0 : i32
    %c0_i32_0 = arith.constant 0 : i32
    %c0_i32_1 = arith.constant 0 : i32
    return %arg0, %c0_i32, %c0_i32_0 : i32, i32, i32
  }
  func.func @transform_18(%arg0: i32) -> (i32, i32) {
    %c0_i32 = arith.constant 0 : i32
    %c0_i32_0 = arith.constant 0 : i32
    %c0_i32_1 = arith.constant 0 : i32
    return %c0_i32, %c0_i32_0 : i32, i32
  }
  func.func @transform_19(%arg0: i32) -> (i32, i32) {
    %c0_i32 = arith.constant 0 : i32
    %c0_i32_0 = arith.constant 0 : i32
    %c0_i32_1 = arith.constant 0 : i32
    return %c0_i32, %c0_i32_0 : i32, i32
  }
  func.func @transform_20(%arg0: i32) -> (i32, i32) {
    %c0_i32 = arith.constant 0 : i32
    %c0_i32_0 = arith.constant 0 : i32
    %c0_i32_1 = arith.constant 0 : i32
    return %c0_i32, %c0_i32_0 : i32, i32
  }
  func.func @transform_21(%arg0: i32) -> (i32, i32) {
    %c0_i32 = arith.constant 0 : i32
    %c0_i32_0 = arith.constant 0 : i32
    %c0_i32_1 = arith.constant 0 : i32
    return %c0_i32, %c0_i32_0 : i32, i32
  }
}

</mosaic_0001>

<bundles_post_ra>
// kernel: text_clip_forward.1
= control target key start
LH: loop header
LB: loop body
LE: loop exit
PB: predicated region body
PF: predicated region fallthrough
CT: control target
= control target key end

     0   :  { %s3398_s0 = inlined_call_operand.vmem [shape: f32[2,8,32], index: 0, kind: input, shape index: {}]   ;;  %s3399_s1 = inlined_call_operand.vmem [shape: f32[2,8,1], index: 1, kind: input, shape index: {}]   ;;  %s3400_s2 = inlined_call_operand.vmem [shape: f32[2,1,32], index: 2, kind: input, shape index: {}]   ;;  %s3401_s3 = inlined_call_operand.vmem [shape: f32[2,1,32], index: 3, kind: input, shape index: {}]   ;;  %s3402_s4 = inlined_call_operand.vmem [shape: bf16[2,2,32,16], index: 4, kind: input, shape index: {}]   ;;  %s3403_s5 = inlined_call_operand.vmem [shape: bf16[2,2,32,16], index: 5, kind: input, shape index: {}]   ;;  %s3404_s6 = inlined_call_operand.vmem [shape: bf16[2,2,32,16], index: 6, kind: input, shape index: {}]   ;;  %s3405_s7 = inlined_call_operand.vmem [shape: f32[2,2,1,16], index: 7, kind: input, shape index: {}]   ;;  %s3406_s8 = inlined_call_operand.vmem [shape: f32[2,2,1,16], index: 8, kind: input, shape index: {}]   ;;  %s3407_s9 = inlined_call_operand.vmem [shape: f32[2,2,1,16], index: 9, kind: input, shape index: {}]   ;;  %s3408_s10 = inlined_call_operand.vmem [shape: bf16[2,32,32], index: 10, kind: input, shape index: {}]   ;;  %s3409_s11 = inlined_call_operand.vmem [shape: f32[2,1,32], index: 11, kind: input, shape index: {}]   ;;  %s3410_s12 = inlined_call_operand.vmem [shape: f32[2,1,32], index: 12, kind: input, shape index: {}]   ;;  %s3411_s13 = inlined_call_operand.vmem [shape: f32[2,1,32], index: 13, kind: input, shape index: {}]   ;;  %s3412_s14 = inlined_call_operand.vmem [shape: bf16[2,32,128], index: 14, kind: input, shape index: {}]   ;;  %s3413_s15 = inlined_call_operand.vmem [shape: f32[2,1,128], index: 15, kind: input, shape index: {}]   ;;  %s3414_s16 = inlined_call_operand.vmem [shape: bf16[2,128,32], index: 16, kind: input, shape index: {}]   ;;  %s3415_s17 = inlined_call_operand.vmem [shape: f32[2,1,32], index: 17, kind: input, shape index: {}]   ;;  %s3416_s18 = inlined_call_operand.vmem [shape: f32[1,32], index: 18, kind: input, shape index: {}]   ;;  %s3417_s19 = inlined_call_operand.vmem [shape: f32[1,32], index: 19, kind: input, shape index: {}]   ;;  %s3418_s20 = inlined_call_operand.vmem [shape: bf16[32,16], index: 20, kind: input, shape index: {}]   ;;  %s3419_s21 = inlined_call_operand.hbm [shape: f32[2,16], index: 21, kind: output, shape index: {}]  }
   0x1   :  { %3425 = sst [smem:[#allocation8_spill]] %s3398_s0 }
   0x2   :  { %3426 = sst [smem:[#allocation9_spill]] %s3399_s1 }
   0x3   :  { %3427 = sst [smem:[#allocation10_spill]] %s3400_s2 }
   0x4   :  { %3428 = sst [smem:[#allocation11_spill]] %s3401_s3 }
   0x5   :  { %3429 = sst [smem:[#allocation12_spill]] %s3402_s4 }
   0x6   :  { %3430 = sst [smem:[#allocation13_spill]] %s3403_s5 }
   0x7   :  { %3431 = sst [smem:[#allocation14_spill]] %s3404_s6 }
   0x8   :  { %3432 = sst [smem:[#allocation15_spill]] %s3405_s7 }
   0x9   :  { %3433 = sst [smem:[#allocation16_spill]] %s3406_s8 }
   0xa   :  { %3434 = sst [smem:[#allocation17_spill]] %s3407_s9 }
   0xb   :  { %3435 = sst [smem:[#allocation18_spill]] %s3408_s10 }
   0xc   :  { %3436 = sst [smem:[#allocation19_spill]] %s3409_s11 }
   0xd   :  { %3437 = sst [smem:[#allocation20_spill]] %s3416_s18 }
   0xe   :  { %3438 = sst [smem:[#allocation21_spill]] %s3417_s19 }
   0xf   :  { %3439 = sst [smem:[#allocation22_spill]] %s3418_s20 }
  0x10   :  { %3440 = sst [smem:[#allocation23_spill]] %s3419_s21 }
  0x11   :  { %26 = vsyncpa [#allocation4], 0  ;;  %s3040_s2 = smov 0  }
  0x12 LB: > { %3441 = sst [smem:[#allocation6_spill]] %s2922_s2  ;;  %s3046_s25 = sadd.s32 4294967295, %s2922_s2   ;;  %s2922_s2 = sphi %s3040_s2, %s32_s2  }
  0x13   : > { %p2506_p0 = scmp.ge.s32.totalorder %s2922_s2, 1  ;;  %p716_p1 = scmp.lt.s32.totalorder %s2922_s2, 3 }
  0x15   : > { %p717_p2 = pnand %p2506_p0, %p716_p1 }
  0x17   : > { %720 = sbr.rel (%p717_p2) target bundleno = 3661 (0xe4d), region = 104 }
  0x1c   : > { %p829_p3 = scmp.lt.s32.totalorder %s3046_s25, 1  ;;  %s3444_s2 = sld [smem:[#allocation12_spill]] }
  0x1d   : > { %s3446_s19 = sld [smem:[#allocation13_spill]]  ;;  %p2522_p4 = scmp.ne.s32.totalorder %s3046_s25, 0 }
  0x1e   : > { %s3052_s26 = scalar_select %p829_p3, %s3046_s25, 1 }
  0x1f   : > { %s3447_s6 = sld [smem:[#allocation14_spill]] }
  0x20   : > { %s2604_s22 = sshll.u32 %s3052_s26, 5  ;;  %s2513_s23 = sshll.u32 %s3052_s26, 1 }
  0x21   : > { %s3448_s7 = sld [smem:[#allocation15_spill]]  ;;  %s2607_s21 = sshll.u32 %s3052_s26, 4 }
  0x22   : > { %s3067_s27 = scalar_lea.vmem %s3444_s2, %s2604_s22  ;;  %s3449_s8 = sld [smem:[#allocation16_spill]] }
  0x23   : > { %3445 = sst [smem:[#allocation7_spill]] %s3067_s27  ;;  %s3072_s18 = scalar_lea.vmem %s3446_s19, %s2604_s22 }
  0x24   : > { %s3450_s9 = sld [smem:[#allocation17_spill]]  ;;  %s872_s20 = scalar_lea.vmem %s3410_s12, %s3052_s26 }
  0x25   : > { %s3077_s0 = scalar_lea.vmem %s3447_s6, %s2604_s22  ;;  %s3452_s10 = sld [smem:[#allocation18_spill]] }
  0x26   : > { %s875_s27 = scalar_lea.vmem %s3411_s13, %s3052_s26  ;;  %s883_s22 = scalar_lea.vmem %s3413_s15, %s3052_s26 }
  0x27   : > { %s3082_s5 = scalar_lea.vmem %s3448_s7, %s2513_s23  ;;  %s2609_s6 = sshll.u32 %s3052_s26, 6 }
  0x28   : > { %s3087_s2 = scalar_lea.vmem %s3449_s8, %s2513_s23  ;;  %s3125_s11 = scalar_lea.vmem %s3414_s16, %s2609_s6 }
  0x29   : > { %s891_s8 = scalar_lea.vmem %s3415_s17, %s3052_s26  ;;  %896 = sbr.rel (%p2522_p4) target bundleno = 51 (0x33), region = 108 }
  0x2a   : > { %s3092_s19 = scalar_lea.vmem %s3450_s9, %s2513_s23  ;;  %s3115_s9 = scalar_lea.vmem %s3412_s14, %s2607_s21 }
  0x2b   : > { %s3102_s4 = scalar_lea.vmem %s3452_s10, %s2607_s21  ;;  %s3453_s23 = sld [smem:[#allocation8_spill]] (!%p2522_p4) }
  0x2e   : > { %vm899_vm0 = vcmask 261120  }
  0x31   : > { %v897_v0 = vld [vmem:[%s3453_s23] sm:$0xff]  ;;  %v898_v1 = vld [vmem:[%s3453_s23 + $0x8] sm:$0xff] }
  0x32   : > { %900 = vst.msk [vmem:[#allocation2] sm:$0xff] %vm899_vm0, %v897_v0  ;;  %901 = vst.msk [vmem:[#allocation2 + $0x8] sm:$0xff] %vm899_vm0, %v898_v1 }
  0x33 PF: > { %vm912_vm1 = vcmask 261120   ;;  %s3454_s10 = sld [smem:[#allocation7_spill]]  ;;  %v2924_v17 = vmov 0.0   ;;  %vm2925_vm2 = vmmov 0   ;;  %v2829_v35 = vld [vmem:[%s3072_s18 + $0x8] sm:$0xff]   ;;  %v2830_v37 = vld [vmem:[%s3072_s18] sm:$0xff]  }
  0x34   : > { %2663 = vmatprep.subr.bf16.mxu0 %v2924_v17  ;;  %2687 = vmatprep.subr.bf16.mxu1 %v2924_v17  ;;  %s3455_s28 = sld [smem:[#allocation10_spill]]  ;;  %v2831_v38 = vld [vmem:[%s3077_s0 + $0x8] sm:$0xff]   ;;  %v2832_v39 = vld [vmem:[%s3077_s0] sm:$0xff]   ;;  %vm1162_vm3 = vcmask 130048   ;;  %vm1283_vm4 = vcmask 1043456   ;;  %vm1255_vm6 = vcmask 64512  }
  0x35   : > { %2667 = vmatprep.mubr.msk.bf16.mxu0 %vm2925_vm2, %v2924_v17  ;;  %2689 = vmatprep.mubr.msk.bf16.mxu1 %vm2925_vm2, %v2924_v17  ;;  %s3457_s21 = sld [smem:[#allocation11_spill]]  ;;  %v2529_v44 = vld [vmem:[%s3087_s2] ss:$0 sm:$0xff]  ;;  %p2594_p5 = scmp.ne.s32.totalorder %s3046_s25, 1 }
  0x36   : > { %v2525_v49 = vld [vmem:[%s3082_s5] ss:$0 sm:$0xff]  ;;  %s3462_s30 = sld [smem:[#allocation22_spill]] (!%p2594_p5) }
  0x37   : > { %v2533_v54 = vld [vmem:[%s3092_s19] ss:$0 sm:$0xff] }
  0x39   : > { %v3138_v2 = vld [vmem:[#allocation2] sm:$0xff]  ;;  %v3140_v3 = vld [vmem:[#allocation2 + $0x8] sm:$0xff] }
  0x3a   : > { %v913_v4 = vsel %vm912_vm1, %v3138_v2, 0.0  ;;  %v916_v5 = vsel %vm912_vm1, %v3140_v3, 0.0  ;;  %v2827_v16 = vld [vmem:[%s3454_s10 + $0x8] sm:$0xff]   ;;  %v2828_v18 = vld [vmem:[%s3454_s10] sm:$0xff]   ;;  %s3456_s7 = scalar_lea.vmem %s3455_s28, %s3052_s26 }
  0x3b   : > { %914 = vadd.xlane.f32.xlu0 %v913_v4  ;;  %2664 = vmatpush3.bf16.msra.mxu0 %v2827_v16  ;;  %v2523_v27 = vld [vmem:[%s3456_s7] ss:$0 sm:$0xff]  ;;  %s3458_s24 = scalar_lea.vmem %s3457_s21, %s3052_s26 }
  0x3c   : > { %2665 = vmatprep.subr.bf16.mxu0 %v2924_v17  ;;  %v2524_v31 = vld [vmem:[%s3458_s24] ss:$0 sm:$0xff] }
  0x3f   : > { %917 = vadd.xlane.f32.xlu0 %v916_v5  ;;  %2666 = vmatpush3.bf16.msra.mxu0 %v2828_v18 }
  0x40   : > { %2671 = vmatprep.subr.bf16.mxu0 %v2924_v17 }
  0xc4   : > { %v915_v6 = vpop.xlane.xlu0 %914 }
  0xc5   : > { %v920_v7 = vmul.f32 0.03125, %v915_v6 }
  0xc7   : > { %v922_v8 = vsub.f32 %v3138_v2, %v920_v7 }
  0xc8   : > { %v918_v9 = vpop.xlane.xlu0 %917 }
  0xc9   : > { %v921_v10 = vmul.f32 0.03125, %v918_v9  ;;  %v924_v11 = vmul.f32 %v922_v8, %v922_v8  ;;  %v902_v9 = vlaneseq }
  0xcb   : > { %v923_v12 = vsub.f32 %v3140_v3, %v921_v10  ;;  %v926_v13 = vsel %vm912_vm1, %v924_v11, 0.0  ;;  %v903_v10 = vshrl.u32 %v902_v9, 7  ;;  %v905_v11 = vand.u32 127, %v902_v9 }
  0xcc   : > { %927 = vadd.xlane.f32.xlu1 %v926_v13 }
  0xcd   : > { %v925_v14 = vmul.f32 %v923_v12, %v923_v12  ;;  %vm906_vm5 = vcmp.gt.s32.totalorder %v905_v11, %v903_v10 }
  0xcf   : > { %v929_v15 = vsel %vm912_vm1, %v925_v14, 0.0 }
  0xd0   : > { %930 = vadd.xlane.f32.xlu1 %v929_v15 }
 0x155   : > { %v928_v19 = vpop.xlane.xlu1 %927 }
 0x156   : > { %v932_v20 = vmul.f32 0.03125, %v928_v19 }
 0x158   : > { %v934_v21 = vadd.f32 1e-05, %v932_v20 }
 0x159   : > { %v931_v22 = vpop.xlane.xlu1 %930 }
 0x15a   : > { %2851 = vrsqrt.f32 %v934_v21  ;;  %v933_v23 = vmul.f32 0.03125, %v931_v22 }
 0x15c   : > { %v935_v24 = vadd.f32 1e-05, %v933_v23 }
 0x15e   : > { %2853 = vrsqrt.f32 %v935_v24 }
 0x167   : > { %v2852_v25 = vpop.eup %2851 }
 0x168   : > { %v938_v26 = vmul.f32 %v2852_v25, %v922_v8 }
 0x16a   : > { %v946_v29 = vmul.f32 %v2523_v27, %v938_v26 }
 0x16b   : > { %v2854_v28 = vpop.eup %2853 }
 0x16c   : > { %v939_v30 = vmul.f32 %v2854_v28, %v923_v12  ;;  %v954_v33 = vadd.f32 %v2524_v31, %v946_v29  ;;  %v3210_v12 = vsel %vm906_vm5, -1e+09, %v2924_v17 }
 0x16e   : > { %v947_v32 = vmul.f32 %v2523_v27, %v939_v30 }
 0x170   : > { %v955_v34 = vadd.f32 %v2524_v31, %v947_v32 }
 0x172   : > { %v3171_v36 = vpack.c.bf16 %v955_v34, %v954_v33 }
 0x174   : > { %2668 = vmatmul.mubr.msk.bf16.vlgmr.msra.gmra.mxu0 %vm912_vm1, %v3171_v36 }
 0x175   : > { %2672 = vmatpush3.bf16.msra.mxu0 %v2829_v35  ;;  %2675 = vmatprep.mubr.msk.bf16.mxu0 %vm2925_vm2, %v2924_v17 }
 0x176   : > { %2673 = vmatprep.subr.bf16.mxu0 %v2924_v17 }
 0x179   : > { %2674 = vmatpush3.bf16.msra.mxu0 %v2830_v37 }
 0x17a   : > { %2679 = vmatprep.subr.bf16.mxu0 %v2924_v17 }
 0x17c   : > { %2676 = vmatmul.mubr.msk.bf16.vlgmr.msra.gmra.mxu0 %vm912_vm1, %v3171_v36 }
 0x17d   : > { %2680 = vmatpush3.bf16.msra.mxu0 %v2831_v38  ;;  %2683 = vmatprep.mubr.msk.bf16.mxu0 %vm2925_vm2, %v2924_v17 }
 0x17e   : > { %2681 = vmatprep.subr.bf16.mxu0 %v2924_v17 }
 0x181   : > { %2682 = vmatpush3.bf16.msra.mxu0 %v2832_v39 }
 0x182   : > { %2693 = vmatprep.subr.bf16.mxu0 %v2924_v17 }
 0x184   : > { %2684 = vmatmul.mubr.msk.bf16.vlgmr.msra.gmra.mxu0 %vm912_vm1, %v3171_v36 }
 0x185   : > { %2695 = vmatprep.mubr.msk.bf16.mxu0 %vm2925_vm2, %v2924_v17 }
 0x234   : > { %v1021_v40 = vpop.f32.mrf.mxu0 }
 0x235   : > { %v1022_v55 = vadd.f32 %v2525_v49, %v1021_v40 }
 0x236   : > { %v2669_v41 = vpop.f32.mrf.mxu0 }
 0x237   : > { %v1156_v61 = vpack.c.bf16 %v1022_v55, %v1022_v55  ;;  %v2833_v41 = vld [vmem:[%s3454_s10 + $0x18] sm:$0xff]  }
 0x238   : > { %v1024_v42 = vpop.f32.mrf.mxu0 }
 0x239   : > { %v1025_v62 = vadd.f32 %v2525_v49, %v1024_v42  ;;  %v2837_v49 = vld [vmem:[%s3077_s0 + $0x18] sm:$0xff]  }
 0x23a   : > { %v2670_v43 = vpop.f32.mrf.mxu0 }
 0x23b   : > { %v1157_v6 = vpack.c.bf16 %v1025_v62, %v1025_v62 }
 0x23c   : > { %v1085_v45 = vpop.f32.mrf.mxu0 }
 0x23d   : > { %v1086_v46 = vadd.f32 %v2529_v44, %v1085_v45  ;;  %v2834_v45 = vld [vmem:[%s3454_s10 + $0x10] sm:$0xff]  }
 0x23e   : > { %v2677_v47 = vpop.f32.mrf.mxu0 }
 0x23f   : > { %v1158_v48 = vpack.c.bf16 %v1086_v46, %v1086_v46  ;;  %v2835_v46 = vld [vmem:[%s3072_s18 + $0x18] sm:$0xff]  }
 0x240   : > { %v1088_v50 = vpop.f32.mrf.mxu0 }
 0x241   : > { %v1089_v51 = vadd.f32 %v2529_v44, %v1088_v50  ;;  %v1167_v52 = vsel %vm1162_vm3, %v1158_v48, 0  ;;  %v2836_v48 = vld [vmem:[%s3072_s18 + $0x10] sm:$0xff]  }
 0x242   : > { %v2678_v53 = vpop.f32.mrf.mxu0  ;;  %2688 = vmatpush3.bf16.xpose.msra.mxu1 %v1167_v52  ;;  %v2838_v50 = vld [vmem:[%s3077_s0 + $0x10] sm:$0xff]   ;;  %s3459_s0 = sld [smem:[#allocation19_spill]] }
 0x243   : > { %v1159_v56 = vpack.c.bf16 %v1089_v51, %v1089_v51  ;;  %2699 = vmatprep.subr.bf16.mxu1 %v2924_v17 }
 0x244   : > { %v1149_v57 = vpop.f32.mrf.mxu0 }
 0x245   : > { %v1213_v58 = vsel %vm1162_vm3, %v1159_v56, 0  ;;  %v1150_v59 = vadd.f32 %v2533_v54, %v1149_v57 }
 0x246   : > { %v2685_v60 = vpop.f32.mrf.mxu0  ;;  %2694 = vmatpush3.bf16.xpose.msra.mxu0 %v1213_v58 }
 0x247   : > { %v1160_v63 = vpack.c.bf16 %v1150_v59, %v1150_v59  ;;  %2705 = vmatprep.subr.bf16.mxu0 %v2924_v17 }
 0x248   : > { %v1152_v0 = vpop.f32.mrf.mxu0 }
 0x249   : > { %v1285_v1 = vsel %vm1283_vm4, %v1160_v63, 0  ;;  %v1153_v4 = vadd.f32 %v2533_v54, %v1152_v0  ;;  %2690 = vmatmul.mubr.msk.bf16.vlgmr.msra.gmra.mxu1 %vm1162_vm3, %v1156_v61  ;;  %v2555_v61 = vld [vmem:[%s3087_s2 + $0x1] ss:$0 sm:$0xff]  ;;  %s3460_s2 = scalar_lea.vmem %s3459_s0, %s3052_s26 }
 0x24a   : > { %v2686_v5 = vpop.f32.mrf.mxu0  ;;  %2700 = vmatpush3.bf16.msra.mxu1 %v1285_v1  ;;  %2701 = vmatprep.mubr.msk.bf16.mxu1 %vm2925_vm2, %v2924_v17 }
 0x24b   : > { %v1161_v7 = vpack.c.bf16 %v1153_v4, %v1153_v4  ;;  %2711 = vmatprep.subr.bf16.mxu1 %v2924_v17  ;;  %v2564_v5 = vld [vmem:[%s3092_s19 + $0x1] ss:$0 sm:$0xff]  ;;  %s3464_s19 = sld [smem:[#allocation21_spill]] (!%p2594_p5) }
 0x24d   : > { %v1331_v8 = vsel %vm1283_vm4, %v1161_v7, 0  ;;  %2696 = vmatmul.mubr.msk.bf16.vlgmr.msra.gmra.mxu0 %vm1162_vm3, %v1157_v6  ;;  %v2546_v7 = vld [vmem:[%s3082_s5 + $0x1] ss:$0 sm:$0xff]  ;;  %s3463_s5 = sld [smem:[#allocation20_spill]] (!%p2594_p5) }
 0x24e   : > { %2706 = vmatpush3.bf16.msra.mxu0 %v1331_v8  ;;  %2707 = vmatprep.mubr.msk.bf16.mxu0 %vm2925_vm2, %v2924_v17 }
 0x24f   : > { %2719 = vmatprep.subr.bf16.mxu0 %v2924_v17 }
 0x309   : > { %v1203_v13 = vpop.f32.mrf.mxu1 }
 0x30a   : > { %v1204_v14 = vadd.f32 %v1203_v13, %v3210_v12 }
 0x30b   : > { %v2691_v15 = vpop.f32.mrf.mxu1 }
 0x30c   : > { %v1256_v16 = vsel %vm1255_vm6, %v1204_v14, -inf }
 0x30d   : > { %v1206_v18 = vpop.f32.mrf.mxu1  ;;  %v1249_v19 = vpop.f32.mrf.mxu0  ;;  %1257 = vmax.xlane.f32.xlu1 %v1256_v16 }
 0x30e   : > { %v1250_v20 = vadd.f32 %v1249_v19, %v3210_v12 }
 0x30f   : > { %v2692_v21 = vpop.f32.mrf.mxu1  ;;  %v2697_v22 = vpop.f32.mrf.mxu0 }
 0x310   : > { %v1259_v23 = vsel %vm1255_vm6, %v1250_v20, -inf }
 0x311   : > { %v1252_v24 = vpop.f32.mrf.mxu0  ;;  %1260 = vmax.xlane.f32.xlu0 %v1259_v23 }
 0x313   : > { %v2698_v25 = vpop.f32.mrf.mxu0 }
 0x396   : > { %v1258_v26 = vpop.xlane.xlu1 %1257 }
 0x397   : > { %v1262_v27 = vsub.f32 %v1204_v14, %v1258_v26 }
 0x399   : > { %v1264_v28 = vmul.f32 1.442695, %v1262_v27 }
 0x39a   : > { %v1261_v29 = vpop.xlane.xlu0 %1260 }
 0x39b   : > { %2855 = vpow2.f32 %v1264_v28  ;;  %v1263_v30 = vsub.f32 %v1250_v20, %v1261_v29 }
 0x39d   : > { %v1266_v31 = vmul.f32 1.442695, %v1263_v30 }
 0x39f   : > { %2857 = vpow2.f32 %v1266_v31 }
 0x3a8   : > { %v2856_v32 = vpop.eup %2855 }
 0x3a9   : > { %v1268_v33 = vsel %vm1255_vm6, %v2856_v32, 0.0 }
 0x3aa   : > { %1269 = vadd.xlane.f32.xlu1 %v1268_v33 }
 0x3ac   : > { %v2858_v34 = vpop.eup %2857 }
 0x3ad   : > { %v1271_v35 = vsel %vm1255_vm6, %v2858_v34, 0.0 }
 0x3ae   : > { %1272 = vadd.xlane.f32.xlu0 %v1271_v35 }
 0x433   : > { %v1270_v37 = vpop.xlane.xlu1 %1269 }
 0x434   : > { %2859 = vrcp.f32 %v1270_v37 }
 0x437   : > { %v1273_v38 = vpop.xlane.xlu0 %1272 }
 0x438   : > { %2861 = vrcp.f32 %v1273_v38 }
 0x441   : > { %v2860_v39 = vpop.eup %2859 }
 0x442   : > { %v1276_v40 = vmul.f32 %v2860_v39, %v2856_v32 }
 0x444   : > { %v1278_v42 = vpack.c.bf16 %v1276_v40, %v1276_v40 }
 0x445   : > { %v2862_v43 = vpop.eup %2861 }
 0x446   : > { %2702 = vmatmul.mubr.msk.bf16.vlgmr.msra.gmra.mxu1 %vm1255_vm6, %v1278_v42  ;;  %v1277_v44 = vmul.f32 %v2862_v43, %v2858_v34 }
 0x447   : > { %2712 = vmatpush3.bf16.msra.mxu1 %v2833_v41  ;;  %2715 = vmatprep.mubr.msk.bf16.mxu1 %vm2925_vm2, %v2924_v17 }
 0x448   : > { %v1279_v47 = vpack.c.bf16 %v1277_v44, %v1277_v44  ;;  %2713 = vmatprep.subr.bf16.mxu1 %v2924_v17 }
 0x44a   : > { %2708 = vmatmul.mubr.msk.bf16.vlgmr.msra.gmra.mxu0 %vm1255_vm6, %v1279_v47 }
 0x44b   : > { %2714 = vmatpush3.bf16.msra.mxu1 %v2834_v45  ;;  %2720 = vmatpush3.bf16.msra.mxu0 %v2835_v46 }
 0x44c   : > { %2721 = vmatprep.subr.bf16.mxu0 %v2924_v17  ;;  %2727 = vmatprep.subr.bf16.mxu1 %v2924_v17 }
 0x44d   : > { %2723 = vmatprep.mubr.msk.bf16.mxu0 %vm2925_vm2, %v2924_v17 }
 0x44e   : > { %2716 = vmatmul.mubr.msk.bf16.vlgmr.msra.gmra.mxu1 %vm912_vm1, %v3171_v36 }
 0x44f   : > { %2722 = vmatpush3.bf16.msra.mxu0 %v2836_v48  ;;  %2728 = vmatpush3.bf16.msra.mxu1 %v2837_v49 }
 0x450   : > { %2729 = vmatprep.subr.bf16.mxu1 %v2924_v17  ;;  %2731 = vmatprep.mubr.msk.bf16.mxu1 %vm2925_vm2, %v2924_v17 }
 0x451   : > { %2735 = vmatprep.subr.bf16.mxu0 %v2924_v17 }
 0x452   : > { %2724 = vmatmul.mubr.msk.bf16.vlgmr.msra.gmra.mxu0 %vm912_vm1, %v3171_v36 }
 0x453   : > { %2730 = vmatpush3.bf16.msra.mxu1 %v2838_v50  ;;  %2737 = vmatprep.mubr.msk.bf16.mxu0 %vm2925_vm2, %v2924_v17 }
 0x454   : > { %2741 = vmatprep.subr.bf16.mxu1 %v2924_v17 }
 0x456   : > { %2732 = vmatmul.mubr.msk.bf16.vlgmr.msra.gmra.mxu1 %vm912_vm1, %v3171_v36 }
 0x457   : > { %2743 = vmatprep.mubr.msk.bf16.mxu1 %vm2925_vm2, %v2924_v17 }
 0x506   : > { %v3248_v51 = vpop.f32.mrf.mxu1 }
 0x508   : > { %v2703_v52 = vpop.f32.mrf.mxu1 }
 0x50a   : > { %v1324_v53 = vpop.f32.mrf.mxu1  ;;  %v3250_v54 = vpop.f32.mrf.mxu0 }
 0x50b   : > { %v1373_v55 = vpack.c.bf16 %v3250_v54, %v3248_v51 }
 0x50c   : > { %v2704_v56 = vpop.f32.mrf.mxu1  ;;  %v2709_v57 = vpop.f32.mrf.mxu0 }
 0x50e   : > { %v1370_v58 = vpop.f32.mrf.mxu0  ;;  %v1433_v59 = vpop.f32.mrf.mxu1 }
 0x50f   : > { %v1434_v16 = vadd.f32 %v2546_v7, %v1433_v59 }
 0x510   : > { %v2710_v60 = vpop.f32.mrf.mxu0  ;;  %v2717_v36 = vpop.f32.mrf.mxu1 }
 0x511   : > { %v1572_v24 = vpack.c.bf16 %v1434_v16, %v1434_v16 }
 0x512   : > { %v1436_v62 = vpop.f32.mrf.mxu1  ;;  %v1499_v63 = vpop.f32.mrf.mxu0 }
 0x513   : > { %v1500_v0 = vadd.f32 %v2555_v61, %v1499_v63  ;;  %v1437_v25 = vadd.f32 %v2546_v7, %v1436_v62  ;;  %v2840_v63 = vld [vmem:[%s3102_s4 + $0x8] sm:$0xff]  }
 0x514   : > { %v2718_v1 = vpop.f32.mrf.mxu1  ;;  %v2725_v4 = vpop.f32.mrf.mxu0 }
 0x515   : > { %v1574_v6 = vpack.c.bf16 %v1500_v0, %v1500_v0  ;;  %v1573_v28 = vpack.c.bf16 %v1437_v25, %v1437_v25 }
 0x516   : > { %v1502_v8 = vpop.f32.mrf.mxu0  ;;  %v1565_v9 = vpop.f32.mrf.mxu1 }
 0x517   : > { %v1582_v10 = vsel %vm1162_vm3, %v1574_v6, 0  ;;  %v1503_v11 = vadd.f32 %v2555_v61, %v1502_v8  ;;  %v1566_v13 = vadd.f32 %v2564_v5, %v1565_v9  ;;  %v2839_v61 = vld [vmem:[%s3102_s4] sm:$0xff]  }
 0x518   : > { %v2726_v14 = vpop.f32.mrf.mxu0  ;;  %v2733_v15 = vpop.f32.mrf.mxu1  ;;  %2736 = vmatpush3.bf16.xpose.msra.mxu0 %v1582_v10 }
 0x519   : > { %v1575_v18 = vpack.c.bf16 %v1503_v11, %v1503_v11  ;;  %2747 = vmatprep.subr.bf16.mxu0 %v2924_v17  ;;  %v1576_v21 = vpack.c.bf16 %v1566_v13, %v1566_v13  ;;  %v2576_v15 = vld [vmem:[%s3460_s2] ss:$0 sm:$0xff] }
 0x51a   : > { %v1568_v19 = vpop.f32.mrf.mxu1 }
 0x51b   : > { %v1628_v20 = vsel %vm1162_vm3, %v1575_v18, 0  ;;  %v1569_v22 = vadd.f32 %v2564_v5, %v1568_v19  ;;  %v1698_v26 = vsel %vm1283_vm4, %v1576_v21, 0 }
 0x51c   : > { %v2734_v23 = vpop.f32.mrf.mxu1  ;;  %2742 = vmatpush3.bf16.xpose.msra.mxu1 %v1628_v20 }
 0x51d   : > { %2753 = vmatprep.subr.bf16.mxu1 %v2924_v17  ;;  %v1577_v27 = vpack.c.bf16 %v1569_v22, %v1569_v22 }
 0x51f   : > { %2738 = vmatmul.mubr.msk.bf16.vlgmr.msra.gmra.mxu0 %vm1162_vm3, %v1572_v24  ;;  %v1744_v29 = vsel %vm1283_vm4, %v1577_v27, 0 }
 0x520   : > { %2748 = vmatpush3.bf16.msra.mxu0 %v1698_v26  ;;  %2749 = vmatprep.mubr.msk.bf16.mxu0 %vm2925_vm2, %v2924_v17 }
 0x521   : > { %2759 = vmatprep.subr.bf16.mxu0 %v2924_v17 }
 0x523   : > { %2744 = vmatmul.mubr.msk.bf16.vlgmr.msra.gmra.mxu1 %vm1162_vm3, %v1573_v28 }
 0x524   : > { %2754 = vmatpush3.bf16.msra.mxu1 %v1744_v29  ;;  %2755 = vmatprep.mubr.msk.bf16.mxu1 %vm2925_vm2, %v2924_v17 }
 0x525   : > { %2765 = vmatprep.subr.bf16.mxu1 %v2924_v17 }
 0x5df   : > { %v1618_v30 = vpop.f32.mrf.mxu0 }
 0x5e0   : > { %v1619_v31 = vadd.f32 %v1618_v30, %v3210_v12 }
 0x5e1   : > { %v2739_v32 = vpop.f32.mrf.mxu0 }
 0x5e2   : > { %v1670_v33 = vsel %vm1255_vm6, %v1619_v31, -inf }
 0x5e3   : > { %1671 = vmax.xlane.f32.xlu0 %v1670_v33  ;;  %v1621_v34 = vpop.f32.mrf.mxu0  ;;  %v1664_v35 = vpop.f32.mrf.mxu1 }
 0x5e4   : > { %v1665_v37 = vadd.f32 %v1664_v35, %v3210_v12  ;;  %v2841_v35 = vld [vmem:[%s3115_s9 + $0x8] sm:$0xff]  }
 0x5e5   : > { %v2740_v38 = vpop.f32.mrf.mxu0  ;;  %v2745_v39 = vpop.f32.mrf.mxu1 }
 0x5e6   : > { %v1673_v40 = vsel %vm1255_vm6, %v1665_v37, -inf }
 0x5e7   : > { %1674 = vmax.xlane.f32.xlu1 %v1673_v40  ;;  %v1667_v41 = vpop.f32.mrf.mxu1 }
 0x5e9   : > { %v2746_v42 = vpop.f32.mrf.mxu1 }
 0x66c   : > { %v1672_v43 = vpop.xlane.xlu0 %1671 }
 0x66d   : > { %v1676_v44 = vsub.f32 %v1619_v31, %v1672_v43 }
 0x66f   : > { %v1678_v45 = vmul.f32 1.442695, %v1676_v44 }
 0x670   : > { %v1675_v46 = vpop.xlane.xlu1 %1674 }
 0x671   : > { %2863 = vpow2.f32 %v1678_v45  ;;  %v1677_v47 = vsub.f32 %v1665_v37, %v1675_v46  ;;  %v2842_v37 = vld [vmem:[%s3115_s9] sm:$0xff]  }
 0x672   : > { %v2577_v46 = vld [vmem:[%s872_s20] ss:$0 sm:$0xff] }
 0x673   : > { %v1680_v48 = vmul.f32 1.442695, %v1677_v47 }
 0x675   : > { %2865 = vpow2.f32 %v1680_v48 }
 0x67e   : > { %v2864_v49 = vpop.eup %2863 }
 0x67f   : > { %v1682_v50 = vsel %vm1255_vm6, %v2864_v49, 0.0 }
 0x680   : > { %1683 = vadd.xlane.f32.xlu0 %v1682_v50  ;;  %v2578_v50 = vld [vmem:[%s875_s27] ss:$0 sm:$0xff] }
 0x682   : > { %v2866_v12 = vpop.eup %2865 }
 0x683   : > { %v1685_v52 = vsel %vm1255_vm6, %v2866_v12, 0.0 }
 0x684   : > { %1686 = vadd.xlane.f32.xlu1 %v1685_v52 }
 0x709   : > { %v1684_v53 = vpop.xlane.xlu0 %1683 }
 0x70a   : > { %2867 = vrcp.f32 %v1684_v53 }
 0x70d   : > { %v1687_v56 = vpop.xlane.xlu1 %1686 }
 0x70e   : > { %2869 = vrcp.f32 %v1687_v56 }
 0x717   : > { %v2868_v57 = vpop.eup %2867 }
 0x718   : > { %v1690_v58 = vmul.f32 %v2868_v57, %v2864_v49  ;;  %v2843_v57 = vld [vmem:[%s3125_s11 + $0x38] sm:$0xff]  }
 0x71a   : > { %v1692_v59 = vpack.c.bf16 %v1690_v58, %v1690_v58  ;;  %v2844_v58 = vld [vmem:[%s3125_s11 + $0x30] sm:$0xff]  }
 0x71b   : > { %v2870_v60 = vpop.eup %2869 }
 0x71c   : > { %2750 = vmatmul.mubr.msk.bf16.vlgmr.msra.gmra.mxu0 %vm1255_vm6, %v1692_v59  ;;  %v1691_v36 = vmul.f32 %v2870_v60, %v2866_v12  ;;  %v2845_v59 = vld [vmem:[%s3125_s11 + $0x28] sm:$0xff]   ;;  %v2846_v60 = vld [vmem:[%s3125_s11 + $0x20] sm:$0xff]  }
 0x71d   : > { %2761 = vmatprep.mubr.msk.bf16.mxu0 %vm2925_vm2, %v2924_v17  ;;  %2760 = vmatpush3.bf16.msra.mxu0 %v2840_v63  ;;  %v2850_v63 = vld [vmem:[%s3125_s11] sm:$0xff]  }
 0x71e   : > { %v1693_v62 = vpack.c.bf16 %v1691_v36, %v1691_v36  ;;  %2771 = vmatprep.subr.bf16.mxu0 %v2924_v17  ;;  %v2847_v36 = vld [vmem:[%s3125_s11 + $0x18] sm:$0xff]  }
 0x720   : > { %2756 = vmatmul.mubr.msk.bf16.vlgmr.msra.gmra.mxu1 %vm1255_vm6, %v1693_v62  ;;  %v2849_v62 = vld [vmem:[%s3125_s11 + $0x8] sm:$0xff]  }
 0x721   : > { %2766 = vmatpush3.bf16.msra.mxu1 %v2839_v61  ;;  %2767 = vmatprep.mubr.msk.bf16.mxu1 %vm2925_vm2, %v2924_v17  ;;  %v2848_v61 = vld [vmem:[%s3125_s11 + $0x10] sm:$0xff]  }
 0x722   : > { %2779 = vmatprep.subr.bf16.mxu1 %v2924_v17 }
 0x728   : > { %2768 = vmatmul.mubr.msk.bf16.vlgmr.msra.gmra.mxu1 %vm1162_vm3, %v1373_v55 }
 0x729   : > { %2795 = vmatprep.mubr.msk.bf16.mxu1 %vm2925_vm2, %v2924_v17  ;;  %2780 = vmatpush3.bf16.msra.mxu1 %v2843_v57 }
 0x72a   : > { %2781 = vmatprep.subr.bf16.mxu1 %v2924_v17 }
 0x72d   : > { %2782 = vmatpush3.bf16.msra.mxu1 %v2844_v58 }
 0x72e   : > { %2783 = vmatprep.subr.bf16.mxu1 %v2924_v17 }
 0x731   : > { %2784 = vmatpush3.bf16.msra.mxu1 %v2845_v59 }
 0x732   : > { %2785 = vmatprep.subr.bf16.mxu1 %v2924_v17 }
 0x735   : > { %2786 = vmatpush3.bf16.msra.mxu1 %v2846_v60 }
 0x736   : > { %2787 = vmatprep.subr.bf16.mxu1 %v2924_v17 }
 0x739   : > { %2788 = vmatpush3.bf16.msra.mxu1 %v2847_v36 }
 0x73a   : > { %2789 = vmatprep.subr.bf16.mxu1 %v2924_v17 }
 0x73d   : > { %2790 = vmatpush3.bf16.msra.mxu1 %v2848_v61 }
 0x73e   : > { %2791 = vmatprep.subr.bf16.mxu1 %v2924_v17 }
 0x741   : > { %2792 = vmatpush3.bf16.msra.mxu1 %v2849_v62 }
 0x742   : > { %2793 = vmatprep.subr.bf16.mxu1 %v2924_v17 }
 0x745   : > { %2794 = vmatpush3.bf16.msra.mxu1 %v2850_v63 }
 0x7dc   : > { %v1734_v0 = vpop.f32.mrf.mxu0 }
 0x7de   : > { %v2751_v1 = vpop.f32.mrf.mxu0 }
 0x7e0   : > { %v1737_v4 = vpop.f32.mrf.mxu0  ;;  %v1780_v5 = vpop.f32.mrf.mxu1 }
 0x7e1   : > { %v1786_v6 = vpack.c.bf16 %v1780_v5, %v1734_v0  ;;  %v2579_v0 = vld [vmem:[%s883_s22] ss:$0 sm:$0xff] }
 0x7e2   : > { %v2752_v7 = vpop.f32.mrf.mxu0  ;;  %v2757_v8 = vpop.f32.mrf.mxu1 }
 0x7e3   : > { %2762 = vmatmul.mubr.msk.bf16.vlgmr.msra.gmra.mxu0 %vm1162_vm3, %v1786_v6 }
 0x7e4   : > { %v1783_v51 = vpop.f32.mrf.mxu1  ;;  %2775 = vmatprep.mubr.msk.bf16.mxu0 %vm2925_vm2, %v2924_v17  ;;  %2772 = vmatpush3.bf16.msra.mxu0 %v2841_v35 }
 0x7e5   : > { %2773 = vmatprep.subr.bf16.mxu0 %v2924_v17 }
 0x7e6   : > { %v2758_v54 = vpop.f32.mrf.mxu1 }
 0x7e8   : > { %v1880_v55 = vpop.f32.mrf.mxu1  ;;  %2774 = vmatpush3.bf16.msra.mxu0 %v2842_v37 }
 0x7ea   : > { %v2769_v9 = vpop.f32.mrf.mxu1 }
 0x7ec   : > { %v1883_v10 = vpop.f32.mrf.mxu1 }
 0x7ee   : > { %v2770_v11 = vpop.f32.mrf.mxu1 }
 0x8a3   : > { %v1830_v13 = vpop.f32.mrf.mxu0 }
 0x8a4   : > { %v1881_v14 = vadd.f32 %v1880_v55, %v1830_v13 }
 0x8a5   : > { %v2763_v16 = vpop.f32.mrf.mxu0 }
 0x8a6   : > { %v1887_v18 = vadd.f32 %v1881_v14, %v3138_v2 }
 0x8a7   : > { %v1833_v19 = vpop.f32.mrf.mxu0 }
 0x8a8   : > { %v3302_v20 = vadd.f32 %v2576_v15, %v1887_v18  ;;  %v1884_v21 = vadd.f32 %v1883_v10, %v1833_v19 }
 0x8a9   : > { %v2764_v22 = vpop.f32.mrf.mxu0 }
 0x8aa   : > { %v1888_v23 = vadd.f32 %v1884_v21, %v3140_v3  ;;  %v1900_v24 = vsel %vm912_vm1, %v3302_v20, 0.0  ;;  %v2585_v21 = vld [vmem:[%s891_s8] ss:$0 sm:$0xff]  ;;  %s3461_s8 = sld [smem:[#allocation9_spill]] (!%p2594_p5) }
 0x8ab   : > { %1901 = vadd.xlane.f32.xlu0 %v1900_v24 }
 0x8ac   : > { %v3307_v25 = vadd.f32 %v2576_v15, %v1888_v23 }
 0x8ae   : > { %v1903_v26 = vsel %vm912_vm1, %v3307_v25, 0.0 }
 0x8af   : > { %1904 = vadd.xlane.f32.xlu1 %v1903_v26 }
 0x934   : > { %v1902_v2 = vpop.xlane.xlu0 %1901 }
 0x935   : > { %v1906_v27 = vmul.f32 0.03125, %v1902_v2 }
 0x937   : > { %v1908_v28 = vsub.f32 %v3302_v20, %v1906_v27 }
 0x938   : > { %v1905_v29 = vpop.xlane.xlu1 %1904 }
 0x939   : > { %v1907_v30 = vmul.f32 0.03125, %v1905_v29  ;;  %v1910_v31 = vmul.f32 %v1908_v28, %v1908_v28 }
 0x93b   : > { %v1909_v3 = vsub.f32 %v3307_v25, %v1907_v30  ;;  %v1912_v32 = vsel %vm912_vm1, %v1910_v31, 0.0 }
 0x93c   : > { %1913 = vadd.xlane.f32.xlu0 %v1912_v32 }
 0x93d   : > { %v1911_v33 = vmul.f32 %v1909_v3, %v1909_v3 }
 0x93f   : > { %v1915_v34 = vsel %vm912_vm1, %v1911_v33, 0.0 }
 0x940   : > { %1916 = vadd.xlane.f32.xlu1 %v1915_v34 }
 0x9c5   : > { %v1914_v38 = vpop.xlane.xlu0 %1913 }
 0x9c6   : > { %v1918_v39 = vmul.f32 0.03125, %v1914_v38 }
 0x9c8   : > { %v1920_v40 = vadd.f32 1e-05, %v1918_v39 }
 0x9c9   : > { %v1917_v41 = vpop.xlane.xlu1 %1916 }
 0x9ca   : > { %2871 = vrsqrt.f32 %v1920_v40  ;;  %v1919_v42 = vmul.f32 0.03125, %v1917_v41 }
 0x9cc   : > { %v1921_v43 = vadd.f32 1e-05, %v1919_v42 }
 0x9ce   : > { %2873 = vrsqrt.f32 %v1921_v43 }
 0x9d7   : > { %v2872_v44 = vpop.eup %2871 }
 0x9d8   : > { %v1924_v45 = vmul.f32 %v2872_v44, %v1908_v28 }
 0x9da   : > { %v1932_v49 = vmul.f32 %v2577_v46, %v1924_v45 }
 0x9db   : > { %v2874_v47 = vpop.eup %2873 }
 0x9dc   : > { %v1925_v48 = vmul.f32 %v2874_v47, %v1909_v3  ;;  %v1940_v52 = vadd.f32 %v2578_v50, %v1932_v49 }
 0x9de   : > { %v1933_v12 = vmul.f32 %v2577_v46, %v1925_v48 }
 0x9e0   : > { %v1941_v53 = vadd.f32 %v2578_v50, %v1933_v12 }
 0x9e2   : > { %v1942_v56 = vpack.c.bf16 %v1941_v53, %v1940_v52 }
 0x9e4   : > { %2776 = vmatmul.mubr.msk.bf16.vlgmr.msra.gmra.mxu0 %vm912_vm1, %v1942_v56 }
 0xaa4   : > { %v2003_v1 = vpop.f32.mrf.mxu0 }
 0xaa5   : > { %v2004_v4 = vadd.f32 %v2579_v0, %v2003_v1 }
 0xaa6   : > { %v2777_v5 = vpop.f32.mrf.mxu0 }
 0xaa7   : > { %v2583_v6 = vmul.f32 -1.702, %v2004_v4 }
 0xaa8   : > { %v2006_v7 = vpop.f32.mrf.mxu0 }
 0xaa9   : > { %v2014_v8 = vmul.f32 1.442695, %v2583_v6  ;;  %v2007_v51 = vadd.f32 %v2579_v0, %v2006_v7 }
 0xaaa   : > { %v2778_v54 = vpop.f32.mrf.mxu0 }
 0xaab   : > { %2875 = vpow2.f32 %v2014_v8  ;;  %v2584_v55 = vmul.f32 -1.702, %v2007_v51 }
 0xaad   : > { %v2016_v9 = vmul.f32 1.442695, %v2584_v55 }
 0xaaf   : > { %2877 = vpow2.f32 %v2016_v9 }
 0xab8   : > { %v2876_v17 = vpop.eup %2875 }
 0xab9   : > { %v2018_v10 = vadd.f32 1.0, %v2876_v17 }
 0xabb   : > { %2879 = vrcp.f32 %v2018_v10 }
 0xabc   : > { %v2878_v11 = vpop.eup %2877 }
 0xabd   : > { %v2019_v13 = vadd.f32 1.0, %v2878_v11 }
 0xabf   : > { %2881 = vrcp.f32 %v2019_v13 }
 0xac8   : > { %v2880_v14 = vpop.eup %2879 }
 0xac9   : > { %v2024_v16 = vmul.f32 %v2880_v14, %v2004_v4 }
 0xacc   : > { %v2882_v15 = vpop.eup %2881 }
 0xacd   : > { %v2025_v18 = vmul.f32 %v2882_v15, %v2007_v51 }
 0xacf   : > { %v2026_v19 = vpack.c.bf16 %v2025_v18, %v2024_v16 }
 0xad1   : > { %2796 = vmatmul.mubr.bf16.vlgmr.msra.gmra.mxu1 %v2026_v19 }
 0xb91   : > { %v2132_v22 = vpop.f32.mrf.mxu1 }
 0xb92   : > { %v2133_v23 = vadd.f32 %v2585_v21, %v2132_v22 }
 0xb93   : > { %v2797_v24 = vpop.f32.mrf.mxu1 }
 0xb94   : > { %v2139_v26 = vadd.f32 %v2133_v23, %v3302_v20 }
 0xb95   : > { %v2135_v2 = vpop.f32.mrf.mxu1 }
 0xb96   : > { %2141 = vst.msk [vmem:[#allocation2] sm:$0xff] %vm912_vm1, %v2139_v26  ;;  %v2136_v27 = vadd.f32 %v2585_v21, %v2135_v2  ;;  %2146 = sbr.rel (%p2594_p5) target bundleno = 3640 (0xe38), region = 112 }
 0xb97   : > { %v2798_v28 = vpop.f32.mrf.mxu1 }
 0xb98   : > { %v2140_v29 = vadd.f32 %v2136_v27, %v3307_v25 }
 0xb9a   : > { %2142 = vst.msk [vmem:[#allocation2 + $0x8] sm:$0xff] %vm912_vm1, %v2140_v29 }
 0xb9b   : > { %v2147_v30 = vld [vmem:[%s3461_s8] sm:$0xff]  ;;  %v2926_v31 = vmov 0   ;;  %v2148_v20 = vld [vmem:[%s3461_s8 + $0x8] sm:$0xff]  ;;  %vm2179_vm7 = vcmask 1041409   ;;  %vm2182_vm8 = vcmask 254976   ;;  %v2927_v63 = vmov 0.0  }
 0xb9c   : > { %2883 = vset.pattern.permute.xlu0 %v2926_v31  ;;  %v2884_v62 = vld [vmem:[%s3462_s30 + $0x8] sm:$0xff]   ;;  %2799 = vmatprep.subr.bf16.mxu0 %v2927_v63  ;;  %vm2928_vm9 = vmmov 0   ;;  %v2885_v0 = vld [vmem:[%s3462_s30] sm:$0xff]   ;;  %vm2296_vm10 = vcmask 123904  }
 0xb9d   : > { %2151 = vperm.xlu0 %2883, %v2147_v30   ;;  %2803 = vmatprep.mubr.msk.bf16.mxu0 %vm2928_vm9, %v2927_v63  ;;  %v2595_v7 = vld [vmem:[%s3463_s5] ss:$0 sm:$0xff] }
 0xb9e   : > { %2800 = vmatpush3.bf16.msra.mxu0 %v2884_v62  ;;  %v2596_v54 = vld [vmem:[%s3464_s19] ss:$0 sm:$0xff] }
 0xb9f   : > { %2801 = vmatprep.subr.bf16.mxu0 %v2927_v63 }
 0xba1   : > { %2156 = vperm.xlu0 %2883, %v2148_v20  }
 0xba2   : > { %2802 = vmatpush3.bf16.msra.mxu0 %v2885_v0 }
 0xc18   : > { %v2152_v3 = vpop.permute.xlu0 %2151 }
 0xc19   : > { %v2159_v32 = vmul.f32 %v2152_v3, %v2139_v26 }
 0xc1b   : > { %v2161_v25 = vsel %vm912_vm1, %v2159_v32, 0.0 }
 0xc1c   : > { %v2162_v33 = vrot.slane %v2161_v25, 4  ;;  %v2157_v34 = vpop.permute.xlu0 %2156 }
 0xc1d   : > { %v2160_v35 = vmul.f32 %v2157_v34, %v2140_v29 }
 0xc1e   : > { %v2163_v37 = vadd.f32 %v2162_v33, %v2161_v25 }
 0xc1f   : > { %v2168_v38 = vsel %vm912_vm1, %v2160_v35, 0.0 }
 0xc20   : > { %v2164_v39 = vrot.slane %v2163_v37, 2  ;;  %v2169_v40 = vrot.slane %v2168_v38, 4 }
 0xc22   : > { %v2165_v41 = vadd.f32 %v2164_v39, %v2163_v37  ;;  %v2170_v42 = vadd.f32 %v2169_v40, %v2168_v38 }
 0xc24   : > { %v2171_v43 = vrot.slane %v2170_v42, 2  ;;  %v2166_v44 = vrot.slane %v2165_v41, 1 }
 0xc26   : > { %v2172_v45 = vadd.f32 %v2171_v43, %v2170_v42  ;;  %v2167_v47 = vadd.f32 %v2166_v44, %v2165_v41 }
 0xc28   : > { %v2173_v46 = vrot.slane %v2172_v45, 1 }
 0xc2a   : > { %v2174_v48 = vadd.f32 %v2173_v46, %v2172_v45 }
 0xc2c   : > { %v2180_v49 = vsel %vm2179_vm7, %v2174_v48, %v2167_v47 }
 0xc2d   : > { %v2183_v50 = vsel %vm2182_vm8, %v2180_v49, 0.0 }
 0xc2e   : > { %2184 = vadd.xlane.f32.xlu1 %v2183_v50 }
 0xcb7   : > { %v2185_v12 = vpop.xlane.xlu1 %2184 }
 0xcb8   : > { %v2186_v52 = vmul.f32 0.03125, %v2185_v12 }
 0xcba   : > { %v2188_v53 = vrot.slane %v2186_v52, 1  ;;  %v2191_v56 = vsub.f32 %v2167_v47, %v2186_v52 }
 0xcbc   : > { %v2192_v57 = vsub.f32 %v2174_v48, %v2188_v53  ;;  %v2193_v59 = vmul.f32 %v2191_v56, %v2191_v56 }
 0xcbe   : > { %v2194_v58 = vmul.f32 %v2192_v57, %v2192_v57 }
 0xcc0   : > { %v2197_v60 = vrot.slane %v2194_v58, 7 }
 0xcc2   : > { %v2198_v36 = vsel %vm2179_vm7, %v2197_v60, %v2193_v59 }
 0xcc3   : > { %v2200_v61 = vsel %vm2182_vm8, %v2198_v36, 0.0 }
 0xcc4   : > { %2201 = vadd.xlane.f32.xlu1 %v2200_v61 }
 0xd4d   : > { %v2202_v1 = vpop.xlane.xlu1 %2201 }
 0xd4e   : > { %v2203_v4 = vmul.f32 0.03125, %v2202_v1 }
 0xd50   : > { %v2204_v5 = vadd.f32 1e-05, %v2203_v4 }
 0xd52   : > { %2886 = vrsqrt.f32 %v2204_v5 }
 0xd5f   : > { %v2887_v6 = vpop.eup %2886 }
 0xd60   : > { %v2207_v8 = vrot.slane %v2887_v6, 1  ;;  %v2210_v51 = vmul.f32 %v2887_v6, %v2191_v56 }
 0xd62   : > { %v2211_v55 = vmul.f32 %v2207_v8, %v2192_v57  ;;  %v2218_v9 = vmul.f32 %v2595_v7, %v2210_v51 }
 0xd64   : > { %v2219_v17 = vmul.f32 %v2595_v7, %v2211_v55  ;;  %v2226_v10 = vadd.f32 %v2596_v54, %v2218_v9 }
 0xd66   : > { %v2227_v11 = vadd.f32 %v2596_v54, %v2219_v17  ;;  %v2228_v13 = vpack.c.bf16 %v2226_v10, %v2226_v10 }
 0xd68   : > { %v2229_v14 = vpack.c.bf16 %v2227_v11, %v2227_v11  ;;  %v2236_v16 = vunpack.c.l.b16 %v2228_v13 }
 0xd6a   : > { %v2237_v15 = vunpack.c.l.b16 %v2229_v14 }
 0xd6c   : > { %v2238_v18 = vrot.slane %v2237_v15, 7 }
 0xd6e   : > { %v2239_v19 = vsel %vm2179_vm7, %v2238_v18, %v2236_v16 }
 0xd6f   : > { %v2240_v21 = vpack.c.b16 %v2239_v19, %v2239_v19 }
 0xd71   : > { %2804 = vmatmul.mubr.msk.bf16.vlgmr.msra.gmra.mxu0 %vm912_vm1, %v2240_v21 }
 0xe31   : > { %v2290_v22 = vpop.f32.mrf.mxu0 }
 0xe32   : > { %2297 = vst.msk [vmem:[#allocation3] sm:$0x3] %vm2296_vm10, %v2290_v22 }
 0xe33   : > { %v2805_v23 = vpop.f32.mrf.mxu0 }
 0xe35   : > { %v2293_v24 = vpop.f32.mrf.mxu0 }
 0xe37   : > { %v2806_v26 = vpop.f32.mrf.mxu0 }
 0xe38 PF: > { %p2811_p6 = scmp.eq.s32.totalorder %s3046_s25, 1  ;;  %s2929_s4 = smov [#allocation3]  }
 0xe39   : > { %s2305_s9 = sshll.u32 %s2929_s4, 4  ;;  %s2306_s9 = int_to_ptr.vmem [resolvable:$true] %s2305_s9 }
 0xe3a   : > { %s2888_s3 = scalar_lea.vmem %s2306_s9, 32  ;;  %p2895_p10 = scmp.lt.s32.totalorder %s2306_s9, %s2306_s9 }
 0xe3b   : > { %p2889_p7 = scmp.ne.s32.totalorder %s2306_s9, %s2888_s3  ;;  %p2896_p11 = scmp.lt.s32.totalorder %s2888_s3, %s2888_s3 }
 0xe3d   : > { %p2890_p8 = pnand %p2889_p7, %p2811_p6  ;;  %p2897_p12 = por %p2896_p11, %p2895_p10 }
 0xe3f   : > { %p2891_p9 = pneg %p2890_p8 }
 0xe41   : > { %p2898_p13 = pnand %p2897_p12, %p2891_p9 }
 0xe43   : > { %2901 = shalt.err (!%p2898_p13)
}
 0xe44   : > { %s3465_s11 = sld [smem:[#allocation23_spill]] }
 0xe4a   : > { %2808 = dma.vmem_to_hbm [thread:$0]  (%p2811_p6), %s2306_s9, 32, %s3465_s11, [#allocation4]  }
 0xe4b   : > { %2917 = dma.done.wait (%p2811_p6), [#allocation4], 32  }
 0xe4c   : > { %2919 = vsyncadd (%p2811_p6), [#allocation4], 4294967264 }
 0xe4d PF: > { %s3466_s22 = sld [smem:[#allocation6_spill]] }
 0xe53   : > { %s32_s2 = sadd.s32 1, %s3466_s22  }
 0xe54   : > { %p29_p0 = scmp.ge.s32.totalorder %s32_s2, 4  }
 0xe56   :  { %31 = sbr.rel (!%p29_p0) target bundleno = 18 (0x12), region = 190 }
 0xe5b   :  { %2318 = vsyncpa [#allocation4], 1 }
 0xe5c   :  { %2320 = vsyncpa [#allocation4 + $0x1], 1 }

</bundles_post_ra>
